<compile_context>
chip_gen: v7x
topology: tpu7x:2x2x1
jax: 0.10.0
libtpu: 0.0.40
codegen_flags: <defaults>
</compile_context>

<pallas_src>
import jax
import jax.numpy as jnp
from jax import lax
from jax.experimental import pallas as pl
from jax.experimental.pallas import tpu as pltpu

NUM_LAYERS = 3   # EquiBindModel(num_layers=3)
H = 32           # in_features == hidden_dim (required for h + agg_h, as in PyTorch)
P = 128          # lane-padded slab width
XO = H           # coordinate-lane offset inside the slab


def equibind_kernel(hx_ref, gr_ref, gc_ref,
                    w_ref, b_ref, wfc_ref, bfc_ref, wtr_ref, btr_ref,
                    out_ref):
    hx = hx_ref[...]                       # (N, P) f32 state slab: [h | x | 0]
    gr = gr_ref[...]                       # (E, N) bf16 one-hot of row (scatter target)
    gc = gc_ref[...]                       # (E, N) bf16 one-hot of col (gather source)
    d = gr - gc                            # (E, N) bf16, exact {0, +1, -1}

    E = gr.shape[0]
    lane = lax.broadcasted_iota(jnp.int32, (E, P), 1)
    is_h_lane = lane < H                   # feature lanes vs coordinate/pad lanes

    # --- EGNN layers (static unroll) ---------------------------------------
    for l in range(NUM_LAYERS):
        hx_b = hx.astype(jnp.bfloat16)
        # gather: e_gc = [h[col] | x[col] | 0]
        e_gc = jnp.dot(gc, hx_b, preferred_element_type=jnp.float32)     # (E, P)
        # e_d coordinate lanes = x[row] - x[col]; feature lanes unused
        e_d = jnp.dot(d, hx_b, preferred_element_type=jnp.float32)       # (E, P)

        # fused fc_h / fc_x: W[l] has wh^T in [0:H,0:H] and wx replicated into
        # lanes H..H+2; b[l] likewise.  One matmul + relu -> [m | w w w | 0].
        mw = jnp.dot(e_gc.astype(jnp.bfloat16), w_ref[l],
                     preferred_element_type=jnp.float32) + b_ref[l]
        mw = jnp.maximum(mw, 0.0)                                        # (E, P)

        # messages: m on feature lanes, w * delta_x on coordinate lanes
        msg = mw * jnp.where(is_h_lane, 1.0, e_d)                        # (E, P)

        # scatter_add onto row nodes: Gr^T @ msg  (contract the edge dim)
        agg = lax.dot_general(gr, msg.astype(jnp.bfloat16),
                              dimension_numbers=(((0,), (0,)), ((), ())),
                              preferred_element_type=jnp.float32)        # (N, P)
        hx = hx + agg          # h += agg_h (lanes 0:H), x += agg_x (lanes H:H+3)

    # --- global mean pool + heads (all in padded lane space) ---------------
    pool = jnp.mean(hx, axis=0, keepdims=True)                           # (1, P)
    emb = jnp.maximum(
        jnp.dot(pool.astype(jnp.bfloat16), wfc_ref[...],
                preferred_element_type=jnp.float32) + bfc_ref[...], 0.0)  # (1, P)
    trans = (jnp.dot(emb.astype(jnp.bfloat16), wtr_ref[...],
                     preferred_element_type=jnp.float32) + btr_ref[...])  # (1, P)
    # trans is zero outside the coordinate lanes -> out coord lanes = x + translation
    out_ref[...] = (hx + trans).astype(out_ref.dtype)                    # (N, P)


def knn_graph(pos, k):
    """torch_geometric.knn_graph convention (flow='source_to_target', loop=False):
    row = neighbor (source), col = center (target)."""
    n = pos.shape[0]
    d2 = jnp.sum((pos[:, None, :] - pos[None, :, :]) ** 2, axis=-1)
    d2 = d2 + jnp.eye(n, dtype=d2.dtype) * 1e10          # exclude self loops
    _, nbr = jax.lax.top_k(-d2, k)                       # (N, k)
    row = nbr.reshape(-1)                                # neighbors
    col = jnp.repeat(jnp.arange(n), k)                   # centers
    return row, col


def _pack_params(params):
    """Pack PyTorch-convention Linear weights into lane-padded (P,P)/(1,P) slabs."""
    L = NUM_LAYERS
    wh, bh = params["wh"], params["bh"]                  # (L,H,H) (out,in), (L,H)
    wx, bx = params["wx"], params["bx"]                  # (L,1,H), (L,1)

    w = jnp.zeros((L, P, P), jnp.float32)
    w = w.at[:, :H, :H].set(jnp.swapaxes(wh, 1, 2))      # (in, out)
    wx_col = jnp.swapaxes(wx, 1, 2)                      # (L, H, 1)
    w = w.at[:, :H, XO:XO + 3].set(jnp.broadcast_to(wx_col, (L, H, 3)))
    b = jnp.zeros((L, 1, P), jnp.float32)
    b = b.at[:, 0, :H].set(bh)
    b = b.at[:, 0, XO:XO + 3].set(jnp.broadcast_to(bx, (L, 3)))

    wfc = jnp.zeros((P, P), jnp.float32).at[:H, :H].set(params["wfc"].T)
    bfc = jnp.zeros((1, P), jnp.float32).at[0, :H].set(params["bfc"])
    wtr = jnp.zeros((P, P), jnp.float32).at[:H, XO:XO + 3].set(params["wtr"].T)
    btr = jnp.zeros((1, P), jnp.float32).at[0, XO:XO + 3].set(params["btr"])

    return (w.astype(jnp.bfloat16), b,
            wfc.astype(jnp.bfloat16), bfc,
            wtr.astype(jnp.bfloat16), btr)


def equibind_forward(h, pos, row, col, params):
    """h: (B,N,H) f32, pos: (B,N,3) f32, row/col: (B,E) int32 -> (B,N,3) f32."""
    B, N, _ = h.shape
    E = row.shape[1]

    # lane-padded state slab [h | x | 0]
    hx = jnp.zeros((B, N, P), jnp.float32)
    hx = hx.at[:, :, :H].set(h).at[:, :, XO:XO + 3].set(pos)

    # one-hot gather/scatter matrices (exact in bf16)
    gr = jax.nn.one_hot(row, N, dtype=jnp.bfloat16)      # (B, E, N)
    gc = jax.nn.one_hot(col, N, dtype=jnp.bfloat16)      # (B, E, N)

    w, b, wfc, bfc, wtr, btr = _pack_params(params)

    def batched(shape):
        return pl.BlockSpec((None,) + shape, lambda i: (i,) + (0,) * len(shape))

    def shared(arr):
        return pl.BlockSpec(arr.shape, lambda i, nd=arr.ndim: (0,) * nd)

    out = pl.pallas_call(
        equibind_kernel,
        out_shape=jax.ShapeDtypeStruct((B, N, P), jnp.float32),
        grid=(B,),
        in_specs=[batched((N, P)), batched((E, N)), batched((E, N)),
                  shared(w), shared(b), shared(wfc), shared(bfc),
                  shared(wtr), shared(btr)],
        out_specs=batched((N, P)),
        compiler_params=pltpu.CompilerParams(
            dimension_semantics=("parallel",)),
    )(hx, gr, gc, w, b, wfc, bfc, wtr, btr)

    return out[:, :, XO:XO + 3]                          # (B, N, 3)


if __name__ == "__main__":
    # Small shapes: B=2 graphs, N=16 nodes, H=32 (= in_features = hidden_dim), k=6 -> E=96.
    B, N, K = 2, 16, 6

    key = jax.random.PRNGKey(0)
    ks = jax.random.split(key, 10)
    h0 = jax.random.normal(ks[0], (B, N, H), jnp.float32)     # data.x per graph
    pos = jax.random.normal(ks[1], (B, N, 3), jnp.float32)    # data.pos per graph

    # Deterministic synthetic parameters in PyTorch nn.Linear layout (out, in).
    params = {
        "wh":  0.1 * jax.random.normal(ks[2], (NUM_LAYERS, H, H), jnp.float32),
        "bh":  0.1 * jax.random.normal(ks[3], (NUM_LAYERS, H), jnp.float32),
        "wx":  0.1 * jax.random.normal(ks[4], (NUM_LAYERS, 1, H), jnp.float32),
        "bx":  0.1 * jax.random.normal(ks[5], (NUM_LAYERS, 1), jnp.float32),
        "wfc": 0.1 * jax.random.normal(ks[6], (H, H), jnp.float32),
        "bfc": 0.1 * jax.random.normal(ks[7], (H,), jnp.float32),
        "wtr": 0.1 * jax.random.normal(ks[8], (3, H), jnp.float32),
        "btr": 0.1 * jax.random.normal(ks[9], (3,), jnp.float32),
    }

    row, col = jax.vmap(knn_graph, in_axes=(0, None))(pos, K)  # (B, N*K) each
    out = equibind_forward(h0, pos, row, col, params)
    out = jax.block_until_ready(out)

    assert out.shape == (B, N, 3), out.shape
    assert bool(jnp.all(jnp.isfinite(out)))
    print("KERNEL_OK")
</pallas_src>

<mosaic_0001>
module attributes {stable_mosaic.version = 11 : i64} {
  func.func @equibind_kernel(%arg0: i32, %arg1: memref<1x16x128xf32, #tpu.memory_space<vmem>>, %arg2: memref<1x96x16xbf16, #tpu.memory_space<vmem>>, %arg3: memref<1x96x16xbf16, #tpu.memory_space<vmem>>, %arg4: memref<3x128x128xbf16, #tpu.memory_space<vmem>>, %arg5: memref<3x1x128xf32, #tpu.memory_space<vmem>>, %arg6: memref<128x128xbf16, #tpu.memory_space<vmem>>, %arg7: memref<1x128xf32, #tpu.memory_space<vmem>>, %arg8: memref<128x128xbf16, #tpu.memory_space<vmem>>, %arg9: memref<1x128xf32, #tpu.memory_space<vmem>>, %arg10: memref<1x16x128xf32, #tpu.memory_space<vmem>>) attributes {dimension_semantics = [#tpu.dimension_semantics<parallel>], iteration_bounds = array<i64: 2>, scalar_prefetch = 0 : i64, scratch_operands = 0 : i64, tpu.core_type = #tpu.core_type<tc>, window_params = [{transform_indices = @transform_0, window_bounds = array<i64: 1, 16, 128>}, {transform_indices = @transform_1, window_bounds = array<i64: 1, 96, 16>}, {transform_indices = @transform_2, window_bounds = array<i64: 1, 96, 16>}, {pipeline_mode = #tpu.pipeline_mode<synchronous>, transform_indices = @transform_3, window_bounds = array<i64: 3, 128, 128>}, {pipeline_mode = #tpu.pipeline_mode<synchronous>, transform_indices = @transform_4, window_bounds = array<i64: 3, 1, 128>}, {pipeline_mode = #tpu.pipeline_mode<synchronous>, transform_indices = @transform_5, window_bounds = array<i64: 128, 128>}, {pipeline_mode = #tpu.pipeline_mode<synchronous>, transform_indices = @transform_6, window_bounds = array<i64: 1, 128>}, {pipeline_mode = #tpu.pipeline_mode<synchronous>, transform_indices = @transform_7, window_bounds = array<i64: 128, 128>}, {pipeline_mode = #tpu.pipeline_mode<synchronous>, transform_indices = @transform_8, window_bounds = array<i64: 1, 128>}, {transform_indices = @transform_9, window_bounds = array<i64: 1, 16, 128>}]} {
    %c0 = arith.constant 0 : index
    %c0_0 = arith.constant 0 : index
    %c0_1 = arith.constant 0 : index
    %0 = vector.load %arg1[%c0, %c0_0, %c0_1] : memref<1x16x128xf32, #tpu.memory_space<vmem>>, vector<1x16x128xf32>
    %1 = vector.shape_cast %0 : vector<1x16x128xf32> to vector<16x128xf32>
    %c0_2 = arith.constant 0 : index
    %c0_3 = arith.constant 0 : index
    %c0_4 = arith.constant 0 : index
    %2 = vector.load %arg2[%c0_2, %c0_3, %c0_4] : memref<1x96x16xbf16, #tpu.memory_space<vmem>>, vector<1x96x16xbf16>
    %3 = vector.shape_cast %2 : vector<1x96x16xbf16> to vector<96x16xbf16>
    %c0_5 = arith.constant 0 : index
    %c0_6 = arith.constant 0 : index
    %c0_7 = arith.constant 0 : index
    %4 = vector.load %arg3[%c0_5, %c0_6, %c0_7] : memref<1x96x16xbf16, #tpu.memory_space<vmem>>, vector<1x96x16xbf16>
    %5 = vector.shape_cast %4 : vector<1x96x16xbf16> to vector<96x16xbf16>
    %6 = arith.subf %3, %5 : vector<96x16xbf16>
    %7 = tpu.iota {dimensions = array<i32: 1>} : vector<96x128xi32>
    %c32_i32 = arith.constant 32 : i32
    %8 = vector.broadcast %c32_i32 : i32 to vector<96x128xi32>
    %9 = arith.cmpi slt, %7, %8 : vector<96x128xi32>
    %10 = arith.truncf %1 : vector<16x128xf32> to vector<16x128xbf16>
    %cst = arith.constant dense<0.000000e+00> : vector<96x128xf32>
    %11 = tpu.matmul %5, %10, %cst {dimension_numbers = #tpu.dot_dimension_numbers<[1], [0], [0], [1], [0, 0, 1, 1], [], []>} : vector<96x16xbf16>, vector<16x128xbf16>, vector<96x128xf32> -> vector<96x128xf32>
    %cst_8 = arith.constant dense<0.000000e+00> : vector<96x128xf32>
    %12 = tpu.matmul %6, %10, %cst_8 {dimension_numbers = #tpu.dot_dimension_numbers<[1], [0], [0], [1], [0, 0, 1, 1], [], []>} : vector<96x16xbf16>, vector<16x128xbf16>, vector<96x128xf32> -> vector<96x128xf32>
    %13 = arith.truncf %11 : vector<96x128xf32> to vector<96x128xbf16>
    %c0_9 = arith.constant 0 : index
    %c0_10 = arith.constant 0 : index
    %c0_11 = arith.constant 0 : index
    %14 = vector.load %arg4[%c0_9, %c0_10, %c0_11] : memref<3x128x128xbf16, #tpu.memory_space<vmem>>, vector<1x128x128xbf16>
    %15 = vector.shape_cast %14 : vector<1x128x128xbf16> to vector<128x128xbf16>
    %cst_12 = arith.constant dense<0.000000e+00> : vector<96x128xf32>
    %16 = tpu.matmul %13, %15, %cst_12 {dimension_numbers = #tpu.dot_dimension_numbers<[1], [0], [0], [1], [0, 0, 1, 1], [], []>} : vector<96x128xbf16>, vector<128x128xbf16>, vector<96x128xf32> -> vector<96x128xf32>
    %c0_13 = arith.constant 0 : index
    %c0_14 = arith.constant 0 : index
    %c0_15 = arith.constant 0 : index
    %17 = vector.load %arg5[%c0_13, %c0_14, %c0_15] : memref<3x1x128xf32, #tpu.memory_space<vmem>>, vector<1x1x128xf32>
    %18 = vector.shape_cast %17 : vector<1x1x128xf32> to vector<1x128xf32>
    %19 = vector.broadcast %18 : vector<1x128xf32> to vector<96x128xf32>
    %20 = arith.addf %16, %19 : vector<96x128xf32>
    %cst_16 = arith.constant 0.000000e+00 : f32
    %21 = vector.broadcast %cst_16 : f32 to vector<96x128xf32>
    %22 = arith.maximumf %20, %21 : vector<96x128xf32>
    %cst_17 = arith.constant 1.000000e+00 : f32
    %23 = vector.broadcast %cst_17 : f32 to vector<96x128xf32>
    %24 = arith.select %9, %23, %12 : vector<96x128xi1>, vector<96x128xf32>
    %25 = arith.mulf %22, %24 : vector<96x128xf32>
    %26 = arith.truncf %25 : vector<96x128xf32> to vector<96x128xbf16>
    %cst_18 = arith.constant dense<0.000000e+00> : vector<16x128xf32>
    %27 = tpu.matmul %3, %26, %cst_18 {dimension_numbers = #tpu.dot_dimension_numbers<[0], [0], [1], [1], [0, 1, 1, 1], [], []>} : vector<96x16xbf16>, vector<96x128xbf16>, vector<16x128xf32> -> vector<16x128xf32>
    %28 = arith.addf %1, %27 : vector<16x128xf32>
    %29 = arith.truncf %28 : vector<16x128xf32> to vector<16x128xbf16>
    %cst_19 = arith.constant dense<0.000000e+00> : vector<96x128xf32>
    %30 = tpu.matmul %5, %29, %cst_19 {dimension_numbers = #tpu.dot_dimension_numbers<[1], [0], [0], [1], [0, 0, 1, 1], [], []>} : vector<96x16xbf16>, vector<16x128xbf16>, vector<96x128xf32> -> vector<96x128xf32>
    %cst_20 = arith.constant dense<0.000000e+00> : vector<96x128xf32>
    %31 = tpu.matmul %6, %29, %cst_20 {dimension_numbers = #tpu.dot_dimension_numbers<[1], [0], [0], [1], [0, 0, 1, 1], [], []>} : vector<96x16xbf16>, vector<16x128xbf16>, vector<96x128xf32> -> vector<96x128xf32>
    %32 = arith.truncf %30 : vector<96x128xf32> to vector<96x128xbf16>
    %c1 = arith.constant 1 : index
    %c0_21 = arith.constant 0 : index
    %c0_22 = arith.constant 0 : index
    %33 = vector.load %arg4[%c1, %c0_21, %c0_22] : memref<3x128x128xbf16, #tpu.memory_space<vmem>>, vector<1x128x128xbf16>
    %34 = vector.shape_cast %33 : vector<1x128x128xbf16> to vector<128x128xbf16>
    %cst_23 = arith.constant dense<0.000000e+00> : vector<96x128xf32>
    %35 = tpu.matmul %32, %34, %cst_23 {dimension_numbers = #tpu.dot_dimension_numbers<[1], [0], [0], [1], [0, 0, 1, 1], [], []>} : vector<96x128xbf16>, vector<128x128xbf16>, vector<96x128xf32> -> vector<96x128xf32>
    %c1_24 = arith.constant 1 : index
    %c0_25 = arith.constant 0 : index
    %c0_26 = arith.constant 0 : index
    %36 = vector.load %arg5[%c1_24, %c0_25, %c0_26] : memref<3x1x128xf32, #tpu.memory_space<vmem>>, vector<1x1x128xf32>
    %37 = vector.shape_cast %36 : vector<1x1x128xf32> to vector<1x128xf32>
    %38 = vector.broadcast %37 : vector<1x128xf32> to vector<96x128xf32>
    %39 = arith.addf %35, %38 : vector<96x128xf32>
    %cst_27 = arith.constant 0.000000e+00 : f32
    %40 = vector.broadcast %cst_27 : f32 to vector<96x128xf32>
    %41 = arith.maximumf %39, %40 : vector<96x128xf32>
    %cst_28 = arith.constant 1.000000e+00 : f32
    %42 = vector.broadcast %cst_28 : f32 to vector<96x128xf32>
    %43 = arith.select %9, %42, %31 : vector<96x128xi1>, vector<96x128xf32>
    %44 = arith.mulf %41, %43 : vector<96x128xf32>
    %45 = arith.truncf %44 : vector<96x128xf32> to vector<96x128xbf16>
    %cst_29 = arith.constant dense<0.000000e+00> : vector<16x128xf32>
    %46 = tpu.matmul %3, %45, %cst_29 {dimension_numbers = #tpu.dot_dimension_numbers<[0], [0], [1], [1], [0, 1, 1, 1], [], []>} : vector<96x16xbf16>, vector<96x128xbf16>, vector<16x128xf32> -> vector<16x128xf32>
    %47 = arith.addf %28, %46 : vector<16x128xf32>
    %48 = arith.truncf %47 : vector<16x128xf32> to vector<16x128xbf16>
    %cst_30 = arith.constant dense<0.000000e+00> : vector<96x128xf32>
    %49 = tpu.matmul %5, %48, %cst_30 {dimension_numbers = #tpu.dot_dimension_numbers<[1], [0], [0], [1], [0, 0, 1, 1], [], []>} : vector<96x16xbf16>, vector<16x128xbf16>, vector<96x128xf32> -> vector<96x128xf32>
    %cst_31 = arith.constant dense<0.000000e+00> : vector<96x128xf32>
    %50 = tpu.matmul %6, %48, %cst_31 {dimension_numbers = #tpu.dot_dimension_numbers<[1], [0], [0], [1], [0, 0, 1, 1], [], []>} : vector<96x16xbf16>, vector<16x128xbf16>, vector<96x128xf32> -> vector<96x128xf32>
    %51 = arith.truncf %49 : vector<96x128xf32> to vector<96x128xbf16>
    %c2 = arith.constant 2 : index
    %c0_32 = arith.constant 0 : index
    %c0_33 = arith.constant 0 : index
    %52 = vector.load %arg4[%c2, %c0_32, %c0_33] : memref<3x128x128xbf16, #tpu.memory_space<vmem>>, vector<1x128x128xbf16>
    %53 = vector.shape_cast %52 : vector<1x128x128xbf16> to vector<128x128xbf16>
    %cst_34 = arith.constant dense<0.000000e+00> : vector<96x128xf32>
    %54 = tpu.matmul %51, %53, %cst_34 {dimension_numbers = #tpu.dot_dimension_numbers<[1], [0], [0], [1], [0, 0, 1, 1], [], []>} : vector<96x128xbf16>, vector<128x128xbf16>, vector<96x128xf32> -> vector<96x128xf32>
    %c2_35 = arith.constant 2 : index
    %c0_36 = arith.constant 0 : index
    %c0_37 = arith.constant 0 : index
    %55 = vector.load %arg5[%c2_35, %c0_36, %c0_37] : memref<3x1x128xf32, #tpu.memory_space<vmem>>, vector<1x1x128xf32>
    %56 = vector.shape_cast %55 : vector<1x1x128xf32> to vector<1x128xf32>
    %57 = vector.broadcast %56 : vector<1x128xf32> to vector<96x128xf32>
    %58 = arith.addf %54, %57 : vector<96x128xf32>
    %cst_38 = arith.constant 0.000000e+00 : f32
    %59 = vector.broadcast %cst_38 : f32 to vector<96x128xf32>
    %60 = arith.maximumf %58, %59 : vector<96x128xf32>
    %cst_39 = arith.constant 1.000000e+00 : f32
    %61 = vector.broadcast %cst_39 : f32 to vector<96x128xf32>
    %62 = arith.select %9, %61, %50 : vector<96x128xi1>, vector<96x128xf32>
    %63 = arith.mulf %60, %62 : vector<96x128xf32>
    %64 = arith.truncf %63 : vector<96x128xf32> to vector<96x128xbf16>
    %cst_40 = arith.constant dense<0.000000e+00> : vector<16x128xf32>
    %65 = tpu.matmul %3, %64, %cst_40 {dimension_numbers = #tpu.dot_dimension_numbers<[0], [0], [1], [1], [0, 1, 1, 1], [], []>} : vector<96x16xbf16>, vector<96x128xbf16>, vector<16x128xf32> -> vector<16x128xf32>
    %66 = arith.addf %47, %65 : vector<16x128xf32>
    %cst_41 = arith.constant dense<0.000000e+00> : vector<128xf32>
    %67 = vector.multi_reduction <add>, %66, %cst_41 [0] : vector<16x128xf32> to vector<128xf32>
    %68 = vector.shape_cast %67 : vector<128xf32> to vector<1x128xf32>
    %cst_42 = arith.constant 1.600000e+01 : f32
    %69 = vector.broadcast %cst_42 : f32 to vector<1x128xf32>
    %70 = arith.divf %68, %69 : vector<1x128xf32>
    %71 = arith.truncf %70 : vector<1x128xf32> to vector<1x128xbf16>
    %c0_43 = arith.constant 0 : index
    %c0_44 = arith.constant 0 : index
    %72 = vector.load %arg6[%c0_43, %c0_44] : memref<128x128xbf16, #tpu.memory_space<vmem>>, vector<128x128xbf16>
    %cst_45 = arith.constant dense<0.000000e+00> : vector<1x128xf32>
    %73 = tpu.matmul %71, %72, %cst_45 {dimension_numbers = #tpu.dot_dimension_numbers<[1], [0], [0], [1], [0, 0, 1, 1], [], []>} : vector<1x128xbf16>, vector<128x128xbf16>, vector<1x128xf32> -> vector<1x128xf32>
    %c0_46 = arith.constant 0 : index
    %c0_47 = arith.constant 0 : index
    %74 = vector.load %arg7[%c0_46, %c0_47] : memref<1x128xf32, #tpu.memory_space<vmem>>, vector<1x128xf32>
    %75 = arith.addf %73, %74 : vector<1x128xf32>
    %cst_48 = arith.constant 0.000000e+00 : f32
    %76 = vector.broadcast %cst_48 : f32 to vector<1x128xf32>
    %77 = arith.maximumf %75, %76 : vector<1x128xf32>
    %78 = arith.truncf %77 : vector<1x128xf32> to vector<1x128xbf16>
    %c0_49 = arith.constant 0 : index
    %c0_50 = arith.constant 0 : index
    %79 = vector.load %arg8[%c0_49, %c0_50] : memref<128x128xbf16, #tpu.memory_space<vmem>>, vector<128x128xbf16>
    %cst_51 = arith.constant dense<0.000000e+00> : vector<1x128xf32>
    %80 = tpu.matmul %78, %79, %cst_51 {dimension_numbers = #tpu.dot_dimension_numbers<[1], [0], [0], [1], [0, 0, 1, 1], [], []>} : vector<1x128xbf16>, vector<128x128xbf16>, vector<1x128xf32> -> vector<1x128xf32>
    %c0_52 = arith.constant 0 : index
    %c0_53 = arith.constant 0 : index
    %81 = vector.load %arg9[%c0_52, %c0_53] : memref<1x128xf32, #tpu.memory_space<vmem>>, vector<1x128xf32>
    %82 = arith.addf %80, %81 : vector<1x128xf32>
    %83 = vector.broadcast %82 : vector<1x128xf32> to vector<16x128xf32>
    %84 = arith.addf %66, %83 : vector<16x128xf32>
    %c0_54 = arith.constant 0 : index
    %c0_55 = arith.constant 0 : index
    %c0_56 = arith.constant 0 : index
    %85 = vector.load %arg10[%c0_54, %c0_55, %c0_56] : memref<1x16x128xf32, #tpu.memory_space<vmem>>, vector<1x16x128xf32>
    %86 = vector.shape_cast %85 : vector<1x16x128xf32> to vector<16x128xf32>
    %87 = vector.shape_cast %84 : vector<16x128xf32> to vector<1x16x128xf32>
    tpu.vector_store %arg10[%c0_54, %c0_55, %c0_56], %87 {strides = array<i32>} : memref<1x16x128xf32, #tpu.memory_space<vmem>>, vector<1x16x128xf32>,
    return
  }
  func.func @transform_0(%arg0: i32) -> (i32, i32, i32) {
    %c0_i32 = arith.constant 0 : i32
    %c0_i32_0 = arith.constant 0 : i32
    %c0_i32_1 = arith.constant 0 : i32
    return %arg0, %c0_i32, %c0_i32_0 : i32, i32, i32
  }
  func.func @transform_1(%arg0: i32) -> (i32, i32, i32) {
    %c0_i32 = arith.constant 0 : i32
    %c0_i32_0 = arith.constant 0 : i32
    %c0_i32_1 = arith.constant 0 : i32
    return %arg0, %c0_i32, %c0_i32_0 : i32, i32, i32
  }
  func.func @transform_2(%arg0: i32) -> (i32, i32, i32) {
    %c0_i32 = arith.constant 0 : i32
    %c0_i32_0 = arith.constant 0 : i32
    %c0_i32_1 = arith.constant 0 : i32
    return %arg0, %c0_i32, %c0_i32_0 : i32, i32, i32
  }
  func.func @transform_3(%arg0: i32) -> (i32, i32, i32) {
    %c0_i32 = arith.constant 0 : i32
    %c0_i32_0 = arith.constant 0 : i32
    %c0_i32_1 = arith.constant 0 : i32
    %c0_i32_2 = arith.constant 0 : i32
    return %c0_i32, %c0_i32_0, %c0_i32_1 : i32, i32, i32
  }
  func.func @transform_4(%arg0: i32) -> (i32, i32, i32) {
    %c0_i32 = arith.constant 0 : i32
    %c0_i32_0 = arith.constant 0 : i32
    %c0_i32_1 = arith.constant 0 : i32
    %c0_i32_2 = arith.constant 0 : i32
    return %c0_i32, %c0_i32_0, %c0_i32_1 : i32, i32, i32
  }
  func.func @transform_5(%arg0: i32) -> (i32, i32) {
    %c0_i32 = arith.constant 0 : i32
    %c0_i32_0 = arith.constant 0 : i32
    %c0_i32_1 = arith.constant 0 : i32
    return %c0_i32, %c0_i32_0 : i32, i32
  }
  func.func @transform_6(%arg0: i32) -> (i32, i32) {
    %c0_i32 = arith.constant 0 : i32
    %c0_i32_0 = arith.constant 0 : i32
    %c0_i32_1 = arith.constant 0 : i32
    return %c0_i32, %c0_i32_0 : i32, i32
  }
  func.func @transform_7(%arg0: i32) -> (i32, i32) {
    %c0_i32 = arith.constant 0 : i32
    %c0_i32_0 = arith.constant 0 : i32
    %c0_i32_1 = arith.constant 0 : i32
    return %c0_i32, %c0_i32_0 : i32, i32
  }
  func.func @transform_8(%arg0: i32) -> (i32, i32) {
    %c0_i32 = arith.constant 0 : i32
    %c0_i32_0 = arith.constant 0 : i32
    %c0_i32_1 = arith.constant 0 : i32
    return %c0_i32, %c0_i32_0 : i32, i32
  }
  func.func @transform_9(%arg0: i32) -> (i32, i32, i32) {
    %c0_i32 = arith.constant 0 : i32
    %c0_i32_0 = arith.constant 0 : i32
    %c0_i32_1 = arith.constant 0 : i32
    return %arg0, %c0_i32, %c0_i32_0 : i32, i32, i32
  }
}

</mosaic_0001>

<bundles_post_ra>
// kernel: tpu_custom_call.1
= control target key start
LH: loop header
LB: loop body
LE: loop exit
PB: predicated region body
PF: predicated region fallthrough
CT: control target
= control target key end

     0   :  { %14 = vsyncpa [#allocation3], 0  ;;  %s3604_s0 = inlined_call_operand.vmem [shape: f32[2,16,128], index: 0, kind: input, shape index: {}]   ;;  %s3605_s1 = inlined_call_operand.vmem [shape: bf16[2,96,16], index: 1, kind: input, shape index: {}]   ;;  %s3606_s2 = inlined_call_operand.vmem [shape: bf16[2,96,16], index: 2, kind: input, shape index: {}]   ;;  %s3607_s3 = inlined_call_operand.vmem [shape: bf16[3,128,128], index: 3, kind: input, shape index: {}]   ;;  %s3608_s4 = inlined_call_operand.vmem [shape: f32[3,1,128], index: 4, kind: input, shape index: {}]   ;;  %s3609_s5 = inlined_call_operand.hbm [shape: bf16[128,128], index: 5, kind: input, shape index: {}]   ;;  %s3610_s6 = inlined_call_operand.vmem [shape: f32[1,128], index: 6, kind: input, shape index: {}]   ;;  %s3611_s7 = inlined_call_operand.hbm [shape: bf16[128,128], index: 7, kind: input, shape index: {}]   ;;  %s3612_s8 = inlined_call_operand.vmem [shape: f32[1,128], index: 8, kind: input, shape index: {}]   ;;  %s3613_s9 = inlined_call_operand.hbm [shape: f32[2,16,128], index: 9, kind: output, shape index: {}]  }
   0x1   :  { %15 = vsyncpa [#allocation6], 0 }
   0x2   :  { %16 = vsyncpa [#allocation4], 0 }
   0x3   :  { %18 = vsyncpa [#allocation4 + $0x1], 0  ;;  %s3010_s30 = smov 0   ;;  %s3012_s10 = smov 0  }
   0x4   :  { %s3014_s11 = smov 0   ;;  %s3016_s12 = smov 0  }
   0x5 LB: > { %3620 = sst [smem:[#allocation11_spill]] %s2945_s11  ;;  %s3031_s13 = sadd.s32 4294967295, %s2949_s12   ;;  %s2949_s12 = sphi %s3016_s12, %s3634_s12   ;;  %s2945_s11 = sphi %s3014_s11, %s3636_s11   ;;  %s2941_s10 = sphi %s3012_s10, %s3638_s10   ;;  %s2937_s30 = sphi %s3010_s30, %s3637_s30  }
   0x6   : > { %s2170_s14 = sadd.s32 4294967294, %s2949_s12   ;;  %s3035_s15 = sadd.s32 1, %s2949_s12  }
   0x7   : > { %3621 = sst [smem:[#allocation12_spill]] %s3035_s15  ;;  %s235_s16 = sadd.s32 1, %s2945_s11 }
   0x8   : > { %s232_s17 = ssub.s32 %s2949_s12, %s3035_s15  ;;  %p245_p0 = scmp.ne.s32.totalorder %s2945_s11, %s2941_s10 }
   0x9   : > { %p233_p1 = scmp.eq.s32.totalorder %s232_s17, 0  ;;  %p246_p2 = scmp.eq.s32.totalorder %s3031_s13, 1 }
   0xa   : > { %p251_p3 = scmp.ne.s32.totalorder %s2941_s10, %s2937_s30  ;;  %p252_p4 = scmp.eq.s32.totalorder %s2170_s14, 1 }
   0xb   : > { %s3046_s18 = scalar_select %p233_p1, %s2945_s11, %s235_s16  }
   0xc   : > { %p3048_p5 = por %p246_p2, %p245_p0  ;;  %p3052_p6 = por %p252_p4, %p251_p3 }
   0xd   : > { %3622 = sst [smem:[#allocation13_spill]] %s3046_s18  ;;  %p2171_p7 = scmp.ge.s32.totalorder %s2949_s12, 1 }
   0xe   : > { %s3623_s19 = scalar_select %p3048_p5, 1, 0 }
   0xf   : > { %s3624_s20 = scalar_select %p3052_p6, 1, 0 }
  0x10   : > { %p259_p8 = scmp.lt.s32.totalorder %s2949_s12, 3  ;;  %p3614_p9 = scmp.eq.s32.totalorder %s3031_s13, 0 }
  0x11   : > { %s2951_s22 = smov [#allocation2]   ;;  %s2952_s25 = smov [#allocation5]  }
  0x12   : > { %p3059_p10 = pnand %p2171_p7, %p259_p8  ;;  %s277_s23 = sshll.u32 %s2951_s22, 4  ;;  %s278_s23 = int_to_ptr.vmem [resolvable:$true] %s277_s23 }
  0x13   : > { %s293_s26 = sshll.u32 %s2952_s25, 4  ;;  %s2823_s29 = scalar_lea.hbm %s3609_s5, 1024  ;;  %s3071_s26 = int_to_ptr.vmem [resolvable:$true] %s293_s26 }
  0x14   : > { %s3625_s21 = scalar_select %p3059_p10, 1, 0 }
  0x15   : > { %p2714_p11 = pneg %p3059_p10  ;;  %p2824_p13 = scmp.ne.s32.totalorder %s3609_s5, %s2823_s29 }
  0x16   : > { %p2830_p3 = scmp.lt.u32.totalorder %s2823_s29, %s3609_s5 }
  0x17   : > { %p3067_p12 = pnand %p3614_p9, %p2714_p11 }
  0x19   : > { %p2825_p0 = pneg %p3067_p12 }
  0x1b   : > { %p2826_p1 = pnand %p2825_p0, %p2824_p13 }
  0x1d   : > { %p2827_p2 = pneg %p2826_p1 }
  0x1f   : > { %p2832_p4 = pnand %p2830_p3, %p2827_p2 }
  0x21   : > { %2835 = shalt.err (!%p2832_p4)
}
  0x22   : > { %s2836_s25 = scalar_lea.vmem %s278_s23, 1024  ;;  %p2844_p9 = scmp.lt.s32.totalorder %s278_s23, %s278_s23 }
  0x23   : > { %p2837_p7 = scmp.ne.s32.totalorder %s278_s23, %s2836_s25  ;;  %p2845_p6 = scmp.lt.s32.totalorder %s2836_s25, %s2836_s25 }
  0x25   : > { %p2839_p8 = pnand %p2837_p7, %p2825_p0  ;;  %p2846_p5 = por %p2845_p6, %p2844_p9 }
  0x27   : > { %p2840_p11 = pneg %p2839_p8 }
  0x29   : > { %p2847_p10 = pnand %p2846_p5, %p2840_p11 }
  0x2b   : > { %2850 = shalt.err (!%p2847_p10)
}
  0x2c   : > { %s2953_s27 = smov 64   ;;  %s2954_s28 = smov 4  }
  0x2d   : > { %2717 = dma.hbm_to_vmem [thread:$0]  (!%p3067_p12), %s3609_s5, 1024, %s278_s23, [#allocation3], %s2953_s27, %s2953_s27, %s2954_s28  }
  0x2e   : > { %s2851_s22 = scalar_lea.hbm %s3611_s7, 1024 }
  0x2f   : > { %p2852_p13 = scmp.ne.s32.totalorder %s3611_s7, %s2851_s22  ;;  %p2858_p9 = scmp.lt.u32.totalorder %s2851_s22, %s3611_s7 }
  0x31   : > { %p2854_p5 = pnand %p2852_p13, %p2825_p0 }
  0x33   : > { %p2855_p6 = pneg %p2854_p5 }
  0x35   : > { %p2860_p10 = pnand %p2858_p9, %p2855_p6 }
  0x37   : > { %2863 = shalt.err (!%p2860_p10)
}
  0x38   : > { %s2864_s23 = scalar_lea.vmem %s3071_s26, 1024  ;;  %p2872_p4 = scmp.lt.s32.totalorder %s3071_s26, %s3071_s26 }
  0x39   : > { %p2865_p1 = scmp.ne.s32.totalorder %s3071_s26, %s2864_s23  ;;  %p2873_p7 = scmp.lt.s32.totalorder %s2864_s23, %s2864_s23 }
  0x3b   : > { %p2867_p2 = pnand %p2865_p1, %p2825_p0  ;;  %p2874_p8 = por %p2873_p7, %p2872_p4 }
  0x3d   : > { %p2868_p3 = pneg %p2867_p2 }
  0x3f   : > { %p2875_p11 = pnand %p2874_p8, %p2868_p3 }
  0x41   : > { %2878 = shalt.err (!%p2875_p11)
}
  0x42   : > { %2720 = dma.hbm_to_vmem [thread:$0]  (!%p3067_p12), %s3611_s7, 1024, %s3071_s26, [#allocation6], %s2953_s27, %s2953_s27, %s2954_s28  }
  0x43   : > { %p3627_p13 = scmp.ne.s32.totalorder %s3625_s21, 0 }
  0x44   : > { %p3628_p5 = scmp.eq.s32.totalorder (!%p3627_p13), %s3031_s13, 0 }
  0x45   : > { %336 = sbr.rel (%p3627_p13) target bundleno = 2615 (0xa37), region = 56 }
  0x4c   : > { %2924 = dma.done.wait (%p3628_p5), [#allocation3], 1024   ;;  %p3629_p0 = pmov %p3628_p5 }
  0x4e   : > { %2926 = vsyncadd (%p3629_p0), [#allocation3], 4294966272  ;;  %p3630_p6 = pmov %p3629_p0 }
  0x4f   : > { %p3631_p9 = pmov %p3629_p0 }
  0x50   : > { %2928 = dma.done.wait (%p3630_p6), [#allocation6], 1024  }
  0x51   : > { %2930 = vsyncadd (%p3631_p9), [#allocation6], 4294966272  ;;  %p386_p10 = scmp.lt.s32.totalorder %s3031_s13, 1  ;;  %vm474_vm0 = vcmask 130048   ;;  %v2777_v12 = vld [vmem:[%s3607_s3] sm:$0xff]   ;;  %v2778_v15 = vld [vmem:[%s3607_s3 + $0x8] sm:$0xff]  }
  0x52   : > { %v2779_v18 = vld [vmem:[%s3607_s3 + $0x10] sm:$0xff]   ;;  %v2780_v20 = vld [vmem:[%s3607_s3 + $0x18] sm:$0xff]   ;;  %v2781_v24 = vld [vmem:[%s3607_s3 + $0x20] sm:$0xff]   ;;  %vm2956_vm1 = vmmov 0   ;;  %vm955_vm3 = vcmask 785408   ;;  %s383_s22 = sand.u32 1, %s2941_s10  }
  0x53   : > { %s3132_s18 = scalar_select %p386_p10, %s3031_s13, 1  ;;  %v2782_v26 = vld [vmem:[%s3607_s3 + $0x28] sm:$0xff]   ;;  %v2783_v27 = vld [vmem:[%s3607_s3 + $0x30] sm:$0xff]   ;;  %v2784_v28 = vld [vmem:[%s3607_s3 + $0x38] sm:$0xff]  }
  0x54   : > { %s2178_s25 = sshll.u32 %s383_s22, 4  ;;  %p3632_p1 = scmp.ne.s32.totalorder %s3623_s19, 0 }
  0x55   : > { %s2322_s21 = sshll.u32 %s3132_s18, 4  ;;  %s2703_s24 = smul.u32 48, %s3132_s18 }
  0x56   : > { %s390_s28 = scalar_lea.vmem %s3604_s0, %s2322_s21  ;;  %s385_s15 = scalar_lea.vmem [#allocation7], %s2178_s25 }
  0x57   : > { %s3144_s16 = scalar_lea.vmem %s3606_s2, %s2703_s24  ;;  %v3146_v0 = vld [vmem:[%s390_s28] sm:$0xff]  ;;  %v3148_v1 = vld [vmem:[%s390_s28 + $0x8] sm:$0xff]  ;;  %s3229_s23 = scalar_lea.vmem %s3605_s1, %s2703_s24 }
  0x58   : > { %v3151_v2 = vld [vmem:[%s3144_s16] sm:$0xf]  ;;  %v443_v3 = vpack.c.bf16 %v3148_v1, %v3146_v0  ;;  %v417_v4 = vld [vmem:[%s3144_s16 + $0x4] sm:$0xf]  ;;  %v418_v5 = vld [vmem:[%s3144_s16 + $0x8] sm:$0xf] }
  0x59   : > { %v419_v6 = vld [vmem:[%s3144_s16 + $0xc] sm:$0xf]  ;;  %v3159_v7 = vcombine.low %v3151_v2, %v417_v4  ;;  %v3162_v8 = vld [vmem:[%s3144_s16 + $0x10] sm:$0xf]  ;;  %v3165_v9 = vld [vmem:[%s3144_s16 + $0x14] sm:$0xf] }
  0x5a   : > { %2447 = vmatprep.subr.bf16.mxu0 %v443_v3  ;;  %v3167_v10 = vcombine.low %v418_v5, %v419_v6  ;;  %2461 = vmatprep.subr.bf16.mxu1 %v443_v3  ;;  %v3173_v11 = vcombine.low %v3162_v8, %v3165_v9  ;;  %v422_v13 = vld [vmem:[%s3144_s16 + $0x18] sm:$0xf]  ;;  %v423_v14 = vld [vmem:[%s3144_s16 + $0x1c] sm:$0xf]  ;;  %v3186_v16 = vld [vmem:[%s3144_s16 + $0x20] sm:$0xf] }
  0x5b   : > { %2448 = vmatpush3.bf16.msra.mxu0 %v443_v3  ;;  %2449 = vmatprep.mubr.msk.bf16.mxu0 %vm474_vm0, %v3159_v7  ;;  %v3191_v17 = vld [vmem:[%s3144_s16 + $0x24] sm:$0xf]  ;;  %v3196_v19 = vcombine.low %v422_v13, %v423_v14  ;;  %v426_v22 = vld [vmem:[%s3144_s16 + $0x28] sm:$0xf]  ;;  %v427_v23 = vld [vmem:[%s3144_s16 + $0x2c] sm:$0xf] }
  0x5c   : > { %2462 = vmatpush3.bf16.msra.mxu1 %v443_v3  ;;  %2475 = vmatprep.subr.bf16.mxu0 %v2777_v12  ;;  %v3203_v21 = vcombine.low %v3186_v16, %v3191_v17  ;;  %v3214_v25 = vcombine.low %v426_v22, %v427_v23  ;;  %v404_v29 = vld [vmem:[%s3229_s23] sm:$0xf]  ;;  %v405_v30 = vld [vmem:[%s3229_s23 + $0x4] sm:$0xf]  ;;  %v406_v33 = vld [vmem:[%s3229_s23 + $0x8] sm:$0xf] }
  0x5d   : > { %v428_v31 = vsub.bf16 %v404_v29, %v3151_v2  ;;  %v429_v32 = vsub.bf16 %v405_v30, %v417_v4  ;;  %v407_v34 = vld [vmem:[%s3229_s23 + $0xc] sm:$0xf]  ;;  %v430_v35 = vsub.bf16 %v406_v33, %v418_v5  ;;  %v408_v39 = vld [vmem:[%s3229_s23 + $0x10] sm:$0xf]  ;;  %v409_v40 = vld [vmem:[%s3229_s23 + $0x14] sm:$0xf]  ;;  %v2216_v59 = vcombine.low %v404_v29, %v405_v30 }
  0x5e   : > { %2450 = vmatmul.mubr.msk.bf16.vlgmr.msra.gmra.mrb[0].mxu0 %vm474_vm0, %v3167_v10  ;;  %v431_v36 = vsub.bf16 %v407_v34, %v419_v6  ;;  %v432_v41 = vsub.bf16 %v408_v39, %v3162_v8  ;;  %v433_v42 = vsub.bf16 %v409_v40, %v3165_v9  ;;  %v410_v43 = vld [vmem:[%s3229_s23 + $0x18] sm:$0xf]  ;;  %v411_v44 = vld [vmem:[%s3229_s23 + $0x1c] sm:$0xf]  ;;  %v412_v49 = vld [vmem:[%s3229_s23 + $0x20] sm:$0xf]  ;;  %v2217_v60 = vcombine.low %v406_v33, %v407_v34 }
  0x5f   : > { %2453 = vmatprep.mubr.msk.bf16.mxu0 %vm474_vm0, %v3173_v11  ;;  %2476 = vmatpush3.bf16.msra.mxu0 %v2777_v12  ;;  %v3239_v37 = vcombine.low %v428_v31, %v429_v32  ;;  %v434_v45 = vsub.bf16 %v410_v43, %v422_v13  ;;  %v435_v46 = vsub.bf16 %v411_v44, %v423_v14  ;;  %v413_v50 = vld [vmem:[%s3229_s23 + $0x24] sm:$0xf]  ;;  %v414_v53 = vld [vmem:[%s3229_s23 + $0x28] sm:$0xf]  ;;  %v415_v54 = vld [vmem:[%s3229_s23 + $0x2c] sm:$0xf] }
  0x60   : > { %2477 = vmatprep.subr.bf16.mxu0 %v2778_v15  ;;  %v3241_v38 = vcombine.low %v430_v35, %v431_v36  ;;  %v3253_v47 = vcombine.low %v432_v41, %v433_v42  ;;  %v436_v51 = vsub.bf16 %v412_v49, %v3186_v16  ;;  %v437_v52 = vsub.bf16 %v413_v50, %v3191_v17  ;;  %s2062_s18 = sshll.u32 %s385_s15, 4  ;;  %s2323_s24 = sshll.u32 %s3031_s13, 8  ;;  %s3556_s18 = int_to_ptr.vmem [resolvable:$true] %s2062_s18 }
  0x61   : > { %2463 = vmatprep.mubr.msk.bf16.mxu1 %vm474_vm0, %v3239_v37  ;;  %v3255_v48 = vcombine.low %v434_v45, %v435_v46  ;;  %v438_v55 = vsub.bf16 %v414_v53, %v426_v22  ;;  %v439_v56 = vsub.bf16 %v415_v54, %v427_v23  ;;  %939 = vxpose.xlu0.c.b16.start [1/6] (short) (narrow) %v2216_v59, 16  ;;  %v2955_v35 = vmov 0.0   ;;  %s3561_s27 = scalar_lea.hbm %s3613_s9, %s2323_s24  ;;  %s3563_s28 = scalar_lea.sflag [#allocation4], %s383_s22 }
  0x62   : > { %2464 = vmatmul.mubr.msk.bf16.vlgmr.msra.gmra.mrb[0].mxu1 %vm474_vm0, %v3241_v38  ;;  %v3267_v57 = vcombine.low %v436_v51, %v437_v52  ;;  %v2218_v61 = vcombine.low %v408_v39, %v409_v40  ;;  %v2219_v62 = vcombine.low %v410_v43, %v411_v44  ;;  %v2220_v63 = vcombine.low %v412_v49, %v413_v50  ;;  %v2207_v44 = vld [vmem:[%s3608_s4] ss:$0 sm:$0xff]  ;;  %s2879_s13 = scalar_lea.vmem %s3556_s18, 256  ;;  %s2957_s29 = smov [#allocation7]  }
  0x63   : > { %2478 = vmatpush3.bf16.msra.mxu0 %v2778_v15  ;;  %2467 = vmatprep.mubr.msk.bf16.mxu1 %vm474_vm0, %v3253_v47  ;;  %v3269_v58 = vcombine.low %v438_v55, %v439_v56  ;;  %v2221_v2 = vcombine.low %v414_v53, %v415_v54  ;;  %v440_v42 = vlaneseq  ;;  %p2880_p12 = scmp.ne.s32.totalorder %s3556_s18, %s2879_s13  ;;  %s2883_s14 = sshll.u32 %s2957_s29, 4  ;;  %s2884_s14 = int_to_ptr.vmem [resolvable:$false] %s2883_s14 }
  0x64   : > { %2479 = vmatprep.subr.bf16.mxu0 %v2779_v18  ;;  %2503 = vmatprep.subr.bf16.mxu1 %v2955_v35  ;;  %s2885_s16 = scalar_lea.vmem %s2884_s14, 512  ;;  %p2886_p4 = scmp.lt.s32.totalorder %s3556_s18, %s2884_s14 }
  0x65   : > { %940 = vxpose.xlu0.c.b16.cont [2/6] (short) (narrow) %v2217_v60, 16  ;;  %v3287_v43 = vand.u32 127, %v440_v42  ;;  %p2881_p2 = pnand %p2880_p12, %p3632_p1  ;;  %p2887_p7 = scmp.lt.s32.totalorder %s2885_s16, %s2879_s13 }
  0x66   : > { %2454 = vmatmul.mubr.msk.bf16.gmra.mrb[4].mxu0 %vm474_vm0, %v3196_v19 }
  0x67   : > { %2457 = vmatprep.mubr.msk.bf16.mxu0 %vm474_vm0, %v3203_v21  ;;  %2480 = vmatpush3.bf16.msra.mxu0 %v2779_v18  ;;  %vm442_vm2 = vcmp.lt.s32.totalorder %v3287_v43, 32  ;;  %v2809_v43 = vld [vmem:[#allocation2 + $0x10] sm:$0xff]   ;;  %p2882_p3 = pneg %p2881_p2  ;;  %p2888_p8 = por %p2887_p7, %p2886_p4 }
  0x68   : > { %2481 = vmatprep.subr.bf16.mxu0 %v2780_v20 }
  0x69   : > { %941 = vxpose.xlu0.c.b16.cont [3/6] (short) (narrow) %v2218_v61, 16  ;;  %p2889_p11 = pnand %p2888_p8, %p2882_p3 }
  0x6a   : > { %2468 = vmatmul.mubr.msk.bf16.gmra.mrb[4].mxu1 %vm474_vm0, %v3255_v48 }
  0x6b   : > { %2482 = vmatpush3.bf16.msra.mxu0 %v2780_v20  ;;  %2471 = vmatprep.mubr.msk.bf16.mxu1 %vm474_vm0, %v3267_v57 }
  0x6c   : > { %2483 = vmatprep.subr.bf16.mxu0 %v2781_v24 }
  0x6d   : > { %942 = vxpose.xlu0.c.b16.cont [4/6] (short) (narrow) %v2219_v62, 16 }
  0x6e   : > { %2458 = vmatmul.mubr.msk.bf16.gmra.mrb[8].mxu0 %vm474_vm0, %v3214_v25 }
  0x6f   : > { %2484 = vmatpush3.bf16.msra.mxu0 %v2781_v24 }
  0x70   : > { %2485 = vmatprep.subr.bf16.mxu0 %v2782_v26 }
  0x71   : > { %943 = vxpose.xlu0.c.b16.cont [5/6] (short) (narrow) %v2220_v63, 16 }
  0x72   : > { %2472 = vmatmul.mubr.msk.bf16.gmra.mrb[8].mxu1 %vm474_vm0, %v3269_v58 }
  0x73   : > { %2486 = vmatpush3.bf16.msra.mxu0 %v2782_v26  ;;  %2515 = vmatprep.mubr.msk.bf16.mxu1 %vm2956_vm1, %v2955_v35 }
  0x74   : > { %2487 = vmatprep.subr.bf16.mxu0 %v2783_v27 }
  0x75   : > { %944 = vxpose.xlu0.c.b16.end [6/6] (short) (narrow) %v2221_v2, 16 }
  0x77   : > { %2488 = vmatpush3.bf16.msra.mxu0 %v2783_v27 }
  0x78   : > { %2489 = vmatprep.subr.bf16.mxu0 %v2784_v28 }
  0x7b   : > { %2490 = vmatpush3.bf16.msra.mxu0 %v2784_v28 }
 0x131   : > { %v2451_v3 = vpop.f32.mrb[0].mxu0 }
 0x132   : > { %v527_v4 = vpop.f32.mrb[1].mxu0 }
 0x133   : > { %v2452_v5 = vpop.f32.mrb[2].mxu0 }
 0x134   : > { %v704_v6 = vpack.c.bf16 %v2452_v5, %v2451_v3  ;;  %v530_v8 = vpop.f32.mrb[3].mxu0 }
 0x135   : > { %v703_v9 = vpack.c.bf16 %v530_v8, %v527_v4  ;;  %v2465_v27 = vpop.f32.mrb[0].mxu1 }
 0x136   : > { %v656_v28 = vpop.f32.mrb[1].mxu1  ;;  %v875_v50 = vsel %vm442_vm2, 1.0, %v2465_v27 }
 0x137   : > { %2491 = vmatprep.mubr.bf16.mxu0 %v703_v9  ;;  %v2466_v29 = vpop.f32.mrb[2].mxu1  ;;  %v873_v54 = vsel %vm442_vm2, 1.0, %v656_v28 }
 0x138   : > { %2492 = vmatmul.mubr.bf16.vlgmr.msra.gmra.mrb[12].mxu0 %v704_v6  ;;  %v659_v30 = vpop.f32.mrb[3].mxu1  ;;  %v876_v2 = vsel %vm442_vm2, 1.0, %v2466_v29 }
 0x139   : > { %v2455_v12 = vpop.f32.mrb[4].mxu0  ;;  %v874_v5 = vsel %vm442_vm2, 1.0, %v659_v30 }
 0x13a   : > { %v543_v13 = vpop.f32.mrb[5].mxu0 }
 0x13b   : > { %v2456_v14 = vpop.f32.mrb[6].mxu0 }
 0x13c   : > { %v706_v15 = vpack.c.bf16 %v2456_v14, %v2455_v12  ;;  %v546_v16 = vpop.f32.mrb[7].mxu0 }
 0x13d   : > { %v705_v17 = vpack.c.bf16 %v546_v16, %v543_v13  ;;  %v2469_v31 = vpop.f32.mrb[4].mxu1 }
 0x13e   : > { %v672_v32 = vpop.f32.mrb[5].mxu1 }
 0x13f   : > { %2495 = vmatprep.mubr.bf16.mxu0 %v705_v17  ;;  %v2470_v33 = vpop.f32.mrb[6].mxu1 }
 0x140   : > { %2496 = vmatmul.mubr.bf16.gmra.mrb[16].mxu0 %v706_v15  ;;  %v675_v34 = vpop.f32.mrb[7].mxu1  ;;  %v879_v15 = vsel %vm442_vm2, 1.0, %v2469_v31  ;;  %v880_v30 = vsel %vm442_vm2, 1.0, %v2470_v33 }
 0x141   : > { %v2459_v18 = vpop.f32.mrb[8].mxu0 }
 0x142   : > { %v559_v20 = vpop.f32.mrb[9].mxu0 }
 0x143   : > { %v2460_v22 = vpop.f32.mrb[10].mxu0 }
 0x144   : > { %v708_v23 = vpack.c.bf16 %v2460_v22, %v2459_v18  ;;  %v562_v24 = vpop.f32.mrb[11].mxu0 }
 0x145   : > { %v707_v26 = vpack.c.bf16 %v562_v24, %v559_v20  ;;  %v2473_v36 = vpop.f32.mrb[8].mxu1  ;;  %v877_v20 = vsel %vm442_vm2, 1.0, %v672_v32 }
 0x146   : > { %v3278_v39 = vpop.f32.mrb[9].mxu1 }
 0x147   : > { %2499 = vmatprep.mubr.bf16.mxu0 %v707_v26  ;;  %v3280_v40 = vpop.f32.mrb[10].mxu1 }
 0x148   : > { %2500 = vmatmul.mubr.bf16.gmra.mrb[20].mxu0 %v708_v23  ;;  %v3282_v41 = vpop.f32.mrb[11].mxu1 }
 0x149   : > { %2535 = vmatprep.mubr.msk.bf16.mxu0 %vm474_vm0, %v3239_v37 }
 0x20b   : > { %v2493_v45 = vpop.f32.mrb[12].mxu0 }
 0x20c   : > { %v823_v46 = vadd.f32 %v2493_v45, %v2207_v44  ;;  %v814_v49 = vpop.f32.mrb[13].mxu0 }
 0x20d   : > { %v815_v51 = vadd.f32 %v2207_v44, %v814_v49  ;;  %v2494_v52 = vpop.f32.mrb[14].mxu0 }
 0x20e   : > { %v863_v53 = vmax.f32 %v823_v46, 0.0  ;;  %v826_v55 = vadd.f32 %v2494_v52, %v2207_v44  ;;  %v817_v56 = vpop.f32.mrb[15].mxu0  ;;  %v878_v46 = vsel %vm442_vm2, 1.0, %v675_v34 }
 0x20f   : > { %v861_v59 = vmax.f32 %v815_v51, 0.0  ;;  %v818_v60 = vadd.f32 %v2207_v44, %v817_v56 }
 0x210   : > { %v887_v61 = vmul.f32 %v875_v50, %v863_v53  ;;  %v864_v62 = vmax.f32 %v826_v55, 0.0 }
 0x211   : > { %v885_v63 = vmul.f32 %v873_v54, %v861_v59  ;;  %v862_v3 = vmax.f32 %v818_v60, 0.0  ;;  %v883_v54 = vsel %vm442_vm2, 1.0, %v2473_v36  ;;  %v881_v59 = vsel %vm442_vm2, 1.0, %v3278_v39 }
 0x212   : > { %v888_v4 = vmul.f32 %v876_v2, %v864_v62  ;;  %v884_v36 = vsel %vm442_vm2, 1.0, %v3280_v40  ;;  %v882_v39 = vsel %vm442_vm2, 1.0, %v3282_v41 }
 0x213   : > { %v886_v6 = vmul.f32 %v874_v5, %v862_v3  ;;  %v2497_v8 = vpop.f32.mrb[16].mxu0 }
 0x214   : > { %v898_v9 = vpack.c.bf16 %v888_v4, %v887_v61  ;;  %v839_v12 = vadd.f32 %v2497_v8, %v2207_v44  ;;  %v830_v13 = vpop.f32.mrb[17].mxu0 }
 0x215   : > { %v897_v14 = vpack.c.bf16 %v886_v6, %v885_v63  ;;  %v831_v16 = vadd.f32 %v2207_v44, %v830_v13  ;;  %v2498_v17 = vpop.f32.mrb[18].mxu0 }
 0x216   : > { %v867_v18 = vmax.f32 %v839_v12, 0.0  ;;  %v842_v22 = vadd.f32 %v2498_v17, %v2207_v44  ;;  %v833_v23 = vpop.f32.mrb[19].mxu0  ;;  %v2791_v17 = vld [vmem:[%s3607_s3 + $0x40] sm:$0xff]  }
 0x217   : > { %v865_v24 = vmax.f32 %v831_v16, 0.0  ;;  %v834_v26 = vadd.f32 %v2207_v44, %v833_v23  ;;  %2504 = vmatpush3.bf16.msra.mxu1 %v897_v14  ;;  %v2797_v23 = vld [vmem:[%s3607_s3 + $0x70] sm:$0xff]  }
 0x218   : > { %v891_v27 = vmul.f32 %v879_v15, %v867_v18  ;;  %v868_v28 = vmax.f32 %v842_v22, 0.0  ;;  %2505 = vmatprep.subr.bf16.mxu1 %v2955_v35  ;;  %v2794_v18 = vld [vmem:[%s3607_s3 + $0x58] sm:$0xff]   ;;  %v2796_v22 = vld [vmem:[%s3607_s3 + $0x68] sm:$0xff]  }
 0x219   : > { %v889_v29 = vmul.f32 %v877_v20, %v865_v24  ;;  %v866_v31 = vmax.f32 %v834_v26, 0.0  ;;  %v2795_v20 = vld [vmem:[%s3607_s3 + $0x60] sm:$0xff]   ;;  %v2798_v24 = vld [vmem:[%s3607_s3 + $0x78] sm:$0xff]  }
 0x21a   : > { %v892_v45 = vmul.f32 %v880_v30, %v868_v28 }
 0x21b   : > { %v890_v49 = vmul.f32 %v878_v46, %v866_v31  ;;  %v2501_v32 = vpop.f32.mrb[20].mxu0  ;;  %2506 = vmatpush3.bf16.msra.mxu1 %v898_v9  ;;  %v3325_v9 = vpop.trf.xlu0 }
 0x21c   : > { %v900_v50 = vpack.c.bf16 %v892_v45, %v891_v27  ;;  %v855_v51 = vadd.f32 %v2501_v32, %v2207_v44  ;;  %v846_v52 = vpop.f32.mrb[21].mxu0  ;;  %2507 = vmatprep.subr.bf16.mxu1 %v2955_v35 }
 0x21d   : > { %v899_v53 = vpack.c.bf16 %v890_v49, %v889_v29  ;;  %v847_v55 = vadd.f32 %v2207_v44, %v846_v52  ;;  %v2502_v56 = vpop.f32.mrb[22].mxu0 }
 0x21e   : > { %v871_v33 = vmax.f32 %v855_v51, 0.0  ;;  %v858_v34 = vadd.f32 %v2502_v56, %v2207_v44  ;;  %v849_v60 = vpop.f32.mrb[23].mxu0 }
 0x21f   : > { %v869_v61 = vmax.f32 %v847_v55, 0.0  ;;  %v850_v62 = vadd.f32 %v2207_v44, %v849_v60  ;;  %2508 = vmatpush3.bf16.msra.mxu1 %v899_v53 }
 0x220   : > { %v895_v63 = vmul.f32 %v883_v54, %v871_v33  ;;  %v872_v2 = vmax.f32 %v858_v34, 0.0  ;;  %2509 = vmatprep.subr.bf16.mxu1 %v2955_v35 }
 0x221   : > { %v893_v3 = vmul.f32 %v881_v59, %v869_v61  ;;  %v870_v4 = vmax.f32 %v850_v62, 0.0 }
 0x222   : > { %v896_v5 = vmul.f32 %v884_v36, %v872_v2 }
 0x223   : > { %v894_v6 = vmul.f32 %v882_v39, %v870_v4  ;;  %2510 = vmatpush3.bf16.msra.mxu1 %v900_v50 }
 0x224   : > { %v902_v8 = vpack.c.bf16 %v896_v5, %v895_v63  ;;  %2511 = vmatprep.subr.bf16.mxu1 %v2955_v35 }
 0x225   : > { %v901_v44 = vpack.c.bf16 %v894_v6, %v893_v3  ;;  %v2252_v6 = vld [vmem:[%s3608_s4 + $0x1] ss:$0 sm:$0xff] }
 0x227   : > { %2512 = vmatpush3.bf16.msra.mxu1 %v901_v44 }
 0x228   : > { %2513 = vmatprep.subr.bf16.mxu1 %v2955_v35 }
 0x22b   : > { %2514 = vmatpush3.bf16.msra.mxu1 %v902_v8 }
 0x22e   : > { %2516 = vmatmul.mubr.msk.bf16.vlgmr.msra.gmra.mrb[12].mxu1 %vm955_vm3, %v3325_v9 }
 0x22f   : > { %2521 = vmatprep.mubr.msk.bf16.mxu1 %vm474_vm0, %v3159_v7 }
 0x301   : > { %v993_v40 = vpop.f32.mrb[12].mxu1 }
 0x302   : > { %v2517_v41 = vpop.f32.mrb[13].mxu1  ;;  %v3332_v13 = vadd.f32 %v993_v40, %v3146_v0  ;;  %v2792_v0 = vld [vmem:[%s3607_s3 + $0x48] sm:$0xff]  }
 0x303   : > { %v996_v12 = vpop.f32.mrb[14].mxu1 }
 0x304   : > { %v3335_v14 = vadd.f32 %v996_v12, %v3148_v1  ;;  %v2518_v15 = vpop.f32.mrb[15].mxu1  ;;  %v2793_v1 = vld [vmem:[%s3607_s3 + $0x50] sm:$0xff]  }
 0x306   : > { %v1002_v16 = vpack.c.bf16 %v3335_v14, %v3332_v13 }
 0x308   : > { %2519 = vmatprep.subr.bf16.mxu1 %v1002_v16  ;;  %2533 = vmatprep.subr.bf16.mxu0 %v1002_v16 }
 0x309   : > { %2520 = vmatpush3.bf16.msra.mxu1 %v1002_v16  ;;  %2534 = vmatpush3.bf16.msra.mxu0 %v1002_v16 }
 0x30a   : > { %2547 = vmatprep.subr.bf16.mxu1 %v2791_v17  ;;  %2575 = vmatprep.subr.bf16.mxu0 %v2955_v35 }
 0x30c   : > { %2522 = vmatmul.mubr.msk.bf16.vlgmr.msra.gmra.mrb[16].mxu1 %vm474_vm0, %v3167_v10  ;;  %2536 = vmatmul.mubr.msk.bf16.vlgmr.msra.gmra.mrb[24].mxu0 %vm474_vm0, %v3241_v38 }
 0x30d   : > { %2525 = vmatprep.mubr.msk.bf16.mxu1 %vm474_vm0, %v3173_v11  ;;  %2548 = vmatpush3.bf16.msra.mxu1 %v2791_v17 }
 0x30e   : > { %2549 = vmatprep.subr.bf16.mxu1 %v2792_v0  ;;  %2539 = vmatprep.mubr.msk.bf16.mxu0 %vm474_vm0, %v3253_v47 }
 0x311   : > { %2550 = vmatpush3.bf16.msra.mxu1 %v2792_v0 }
 0x312   : > { %2551 = vmatprep.subr.bf16.mxu1 %v2793_v1 }
 0x314   : > { %2526 = vmatmul.mubr.msk.bf16.gmra.mrb[20].mxu1 %vm474_vm0, %v3196_v19  ;;  %2540 = vmatmul.mubr.msk.bf16.gmra.mrb[28].mxu0 %vm474_vm0, %v3255_v48 }
 0x315   : > { %2529 = vmatprep.mubr.msk.bf16.mxu1 %vm474_vm0, %v3203_v21  ;;  %2552 = vmatpush3.bf16.msra.mxu1 %v2793_v1 }
 0x316   : > { %2553 = vmatprep.subr.bf16.mxu1 %v2794_v18  ;;  %2543 = vmatprep.mubr.msk.bf16.mxu0 %vm474_vm0, %v3267_v57 }
 0x319   : > { %2554 = vmatpush3.bf16.msra.mxu1 %v2794_v18 }
 0x31a   : > { %2555 = vmatprep.subr.bf16.mxu1 %v2795_v20 }
 0x31c   : > { %2530 = vmatmul.mubr.msk.bf16.gmra.mrb[24].mxu1 %vm474_vm0, %v3214_v25  ;;  %2544 = vmatmul.mubr.msk.bf16.gmra.mrb[32].mxu0 %vm474_vm0, %v3269_v58 }
 0x31d   : > { %2556 = vmatpush3.bf16.msra.mxu1 %v2795_v20  ;;  %2587 = vmatprep.mubr.msk.bf16.mxu0 %vm2956_vm1, %v2955_v35 }
 0x31e   : > { %2557 = vmatprep.subr.bf16.mxu1 %v2796_v22 }
 0x321   : > { %2558 = vmatpush3.bf16.msra.mxu1 %v2796_v22 }
 0x322   : > { %2559 = vmatprep.subr.bf16.mxu1 %v2797_v23 }
 0x325   : > { %2560 = vmatpush3.bf16.msra.mxu1 %v2797_v23 }
 0x326   : > { %2561 = vmatprep.subr.bf16.mxu1 %v2798_v24 }
 0x329   : > { %2562 = vmatpush3.bf16.msra.mxu1 %v2798_v24 }
 0x3df   : > { %v2523_v26 = vpop.f32.mrb[16].mxu1  ;;  %v2537_v27 = vpop.f32.mrb[24].mxu0 }
 0x3e0   : > { %v1037_v28 = vpop.f32.mrb[17].mxu1  ;;  %v1118_v34 = vpop.f32.mrb[25].mxu0  ;;  %v1339_v40 = vsel %vm442_vm2, 1.0, %v2537_v27 }
 0x3e1   : > { %v2524_v29 = vpop.f32.mrb[18].mxu1  ;;  %v2538_v60 = vpop.f32.mrb[26].mxu0  ;;  %v1337_v16 = vsel %vm442_vm2, 1.0, %v1118_v34 }
 0x3e2   : > { %v1166_v30 = vpack.c.bf16 %v2524_v29, %v2523_v26  ;;  %v1040_v31 = vpop.f32.mrb[19].mxu1  ;;  %v1121_v61 = vpop.f32.mrb[27].mxu0  ;;  %v1340_v24 = vsel %vm442_vm2, 1.0, %v2538_v60 }
 0x3e3   : > { %v1165_v45 = vpack.c.bf16 %v1040_v31, %v1037_v28  ;;  %v1338_v27 = vsel %vm442_vm2, 1.0, %v1121_v61 }
 0x3e5   : > { %2563 = vmatprep.mubr.bf16.mxu1 %v1165_v45 }
 0x3e6   : > { %2564 = vmatmul.mubr.bf16.vlgmr.msra.gmra.mrb[28].mxu1 %v1166_v30 }
 0x3e7   : > { %v2527_v46 = vpop.f32.mrb[20].mxu1  ;;  %v2541_v62 = vpop.f32.mrb[28].mxu0 }
 0x3e8   : > { %v1053_v49 = vpop.f32.mrb[21].mxu1  ;;  %v1134_v63 = vpop.f32.mrb[29].mxu0 }
 0x3e9   : > { %v2528_v32 = vpop.f32.mrb[22].mxu1  ;;  %v2542_v2 = vpop.f32.mrb[30].mxu0 }
 0x3ea   : > { %v1168_v50 = vpack.c.bf16 %v2528_v32, %v2527_v46  ;;  %v1056_v51 = vpop.f32.mrb[23].mxu1  ;;  %v1137_v3 = vpop.f32.mrb[31].mxu0  ;;  %v1343_v32 = vsel %vm442_vm2, 1.0, %v2541_v62  ;;  %v1344_v61 = vsel %vm442_vm2, 1.0, %v2542_v2 }
 0x3eb   : > { %v1167_v52 = vpack.c.bf16 %v1056_v51, %v1053_v49 }
 0x3ed   : > { %2567 = vmatprep.mubr.bf16.mxu1 %v1167_v52 }
 0x3ee   : > { %2568 = vmatmul.mubr.bf16.gmra.mrb[32].mxu1 %v1168_v50 }
 0x3ef   : > { %v2531_v53 = vpop.f32.mrb[24].mxu1  ;;  %v2545_v36 = vpop.f32.mrb[32].mxu0 }
 0x3f0   : > { %v1069_v54 = vpop.f32.mrb[25].mxu1  ;;  %v1150_v4 = vpop.f32.mrb[33].mxu0 }
 0x3f1   : > { %v2532_v55 = vpop.f32.mrb[26].mxu1  ;;  %v3388_v5 = vpop.f32.mrb[34].mxu0 }
 0x3f2   : > { %v1170_v56 = vpack.c.bf16 %v2532_v55, %v2531_v53  ;;  %v1072_v33 = vpop.f32.mrb[27].mxu1  ;;  %v3390_v39 = vpop.f32.mrb[35].mxu0  ;;  %v1341_v53 = vsel %vm442_vm2, 1.0, %v1134_v63 }
 0x3f3   : > { %v1169_v59 = vpack.c.bf16 %v1072_v33, %v1069_v54 }
 0x3f5   : > { %2571 = vmatprep.mubr.bf16.mxu1 %v1169_v59 }
 0x3f6   : > { %2572 = vmatmul.mubr.bf16.gmra.mrb[36].mxu1 %v1170_v56 }
 0x3f7   : > { %2607 = vmatprep.mubr.msk.bf16.mxu1 %vm474_vm0, %v3239_v37 }
 0x4b9   : > { %v2565_v8 = vpop.f32.mrb[28].mxu1 }
 0x4ba   : > { %v1287_v44 = vadd.f32 %v2565_v8, %v2252_v6  ;;  %v1278_v37 = vpop.f32.mrb[29].mxu1 }
 0x4bb   : > { %v1279_v41 = vadd.f32 %v2252_v6, %v1278_v37  ;;  %v2566_v12 = vpop.f32.mrb[30].mxu1 }
 0x4bc   : > { %v1327_v15 = vmax.f32 %v1287_v44, 0.0  ;;  %v1290_v17 = vadd.f32 %v2566_v12, %v2252_v6  ;;  %v1281_v0 = vpop.f32.mrb[31].mxu1  ;;  %v1342_v44 = vsel %vm442_vm2, 1.0, %v1137_v3 }
 0x4bd   : > { %v1325_v1 = vmax.f32 %v1279_v41, 0.0  ;;  %v1282_v18 = vadd.f32 %v2252_v6, %v1281_v0 }
 0x4be   : > { %v1351_v20 = vmul.f32 %v1339_v40, %v1327_v15  ;;  %v1328_v22 = vmax.f32 %v1290_v17, 0.0 }
 0x4bf   : > { %v1349_v23 = vmul.f32 %v1337_v16, %v1325_v1  ;;  %v1326_v26 = vmax.f32 %v1282_v18, 0.0  ;;  %v1347_v16 = vsel %vm442_vm2, 1.0, %v2545_v36  ;;  %v1345_v1 = vsel %vm442_vm2, 1.0, %v1150_v4 }
 0x4c0   : > { %v1352_v28 = vmul.f32 %v1340_v24, %v1328_v22  ;;  %v1348_v36 = vsel %vm442_vm2, 1.0, %v3388_v5  ;;  %v1346_v4 = vsel %vm442_vm2, 1.0, %v3390_v39 }
 0x4c1   : > { %v1350_v29 = vmul.f32 %v1338_v27, %v1326_v26  ;;  %v2569_v30 = vpop.f32.mrb[32].mxu1 }
 0x4c2   : > { %v1362_v31 = vpack.c.bf16 %v1352_v28, %v1351_v20  ;;  %v1303_v45 = vadd.f32 %v2569_v30, %v2252_v6  ;;  %v1294_v46 = vpop.f32.mrb[33].mxu1 }
 0x4c3   : > { %v1361_v49 = vpack.c.bf16 %v1350_v29, %v1349_v23  ;;  %v1295_v50 = vadd.f32 %v2252_v6, %v1294_v46  ;;  %v2570_v51 = vpop.f32.mrb[34].mxu1 }
 0x4c4   : > { %v1331_v52 = vmax.f32 %v1303_v45, 0.0  ;;  %v1306_v54 = vadd.f32 %v2570_v51, %v2252_v6  ;;  %v1297_v55 = vpop.f32.mrb[35].mxu1 }
 0x4c5   : > { %v1329_v56 = vmax.f32 %v1295_v50, 0.0  ;;  %v1298_v33 = vadd.f32 %v2252_v6, %v1297_v55  ;;  %2576 = vmatpush3.bf16.msra.mxu0 %v1361_v49  ;;  %v2799_v50 = vld [vmem:[%s3607_s3 + $0x80] sm:$0xff]  }
 0x4c6   : > { %v1355_v59 = vmul.f32 %v1343_v32, %v1331_v52  ;;  %v1332_v34 = vmax.f32 %v1306_v54, 0.0  ;;  %2577 = vmatprep.subr.bf16.mxu0 %v2955_v35 }
 0x4c7   : > { %v1353_v60 = vmul.f32 %v1341_v53, %v1329_v56  ;;  %v1330_v62 = vmax.f32 %v1298_v33, 0.0 }
 0x4c8   : > { %v1356_v8 = vmul.f32 %v1344_v61, %v1332_v34 }
 0x4c9   : > { %v1354_v37 = vmul.f32 %v1342_v44, %v1330_v62  ;;  %v2573_v63 = vpop.f32.mrb[36].mxu1  ;;  %2578 = vmatpush3.bf16.msra.mxu0 %v1362_v31 }
 0x4ca   : > { %v1364_v40 = vpack.c.bf16 %v1356_v8, %v1355_v59  ;;  %v1319_v41 = vadd.f32 %v2573_v63, %v2252_v6  ;;  %v1310_v12 = vpop.f32.mrb[37].mxu1  ;;  %2579 = vmatprep.subr.bf16.mxu0 %v2955_v35 }
 0x4cb   : > { %v1363_v15 = vpack.c.bf16 %v1354_v37, %v1353_v60  ;;  %v1311_v17 = vadd.f32 %v2252_v6, %v1310_v12  ;;  %v2574_v0 = vpop.f32.mrb[38].mxu1 }
 0x4cc   : > { %v1335_v2 = vmax.f32 %v1319_v41, 0.0  ;;  %v1322_v18 = vadd.f32 %v2574_v0, %v2252_v6  ;;  %v1313_v3 = vpop.f32.mrb[39].mxu1 }
 0x4cd   : > { %v1333_v20 = vmax.f32 %v1311_v17, 0.0  ;;  %v1314_v22 = vadd.f32 %v2252_v6, %v1313_v3  ;;  %2580 = vmatpush3.bf16.msra.mxu0 %v1363_v15 }
 0x4ce   : > { %v1359_v23 = vmul.f32 %v1347_v16, %v1335_v2  ;;  %v1336_v24 = vmax.f32 %v1322_v18, 0.0  ;;  %2581 = vmatprep.subr.bf16.mxu0 %v2955_v35 }
 0x4cf   : > { %v1357_v26 = vmul.f32 %v1345_v1, %v1333_v20  ;;  %v1334_v28 = vmax.f32 %v1314_v22, 0.0  ;;  %v2291_v1 = vld [vmem:[%s3608_s4 + $0x2] ss:$0 sm:$0xff] }
 0x4d0   : > { %v1360_v27 = vmul.f32 %v1348_v36, %v1336_v24 }
 0x4d1   : > { %v1358_v29 = vmul.f32 %v1346_v4, %v1334_v28  ;;  %2582 = vmatpush3.bf16.msra.mxu0 %v1364_v40 }
 0x4d2   : > { %v1366_v30 = vpack.c.bf16 %v1360_v27, %v1359_v23  ;;  %2583 = vmatprep.subr.bf16.mxu0 %v2955_v35 }
 0x4d3   : > { %v1365_v6 = vpack.c.bf16 %v1358_v29, %v1357_v26 }
 0x4d5   : > { %2584 = vmatpush3.bf16.msra.mxu0 %v1365_v6 }
 0x4d6   : > { %2585 = vmatprep.subr.bf16.mxu0 %v2955_v35 }
 0x4d9   : > { %2586 = vmatpush3.bf16.msra.mxu0 %v1366_v30 }
 0x4dc   : > { %2588 = vmatmul.mubr.msk.bf16.vlgmr.msra.gmra.mrb[36].mxu0 %vm955_vm3, %v3325_v9 }
 0x4dd   : > { %2593 = vmatprep.mubr.msk.bf16.mxu0 %vm474_vm0, %v3159_v7  ;;  %v2800_v7 = vld [vmem:[%s3607_s3 + $0x88] sm:$0xff]  }
 0x5af   : > { %v1401_v5 = vpop.f32.mrb[36].mxu0 }
 0x5b0   : > { %v2589_v31 = vpop.f32.mrb[37].mxu0  ;;  %v3431_v39 = vadd.f32 %v1401_v5, %v3332_v13  ;;  %v2801_v13 = vld [vmem:[%s3607_s3 + $0x90] sm:$0xff]  }
 0x5b1   : > { %v1404_v45 = vpop.f32.mrb[38].mxu0 }
 0x5b2   : > { %v3434_v46 = vadd.f32 %v1404_v45, %v3335_v14  ;;  %v2590_v49 = vpop.f32.mrb[39].mxu0 }
 0x5b4   : > { %v1410_v32 = vpack.c.bf16 %v3434_v46, %v3431_v39 }
 0x5b6   : > { %2591 = vmatprep.subr.bf16.mxu0 %v1410_v32  ;;  %2605 = vmatprep.subr.bf16.mxu1 %v1410_v32 }
 0x5b7   : > { %2592 = vmatpush3.bf16.msra.mxu0 %v1410_v32  ;;  %2606 = vmatpush3.bf16.msra.mxu1 %v1410_v32 }
 0x5b8   : > { %2619 = vmatprep.subr.bf16.mxu0 %v2799_v50  ;;  %2647 = vmatprep.subr.bf16.mxu1 %v2955_v35 }
 0x5ba   : > { %2594 = vmatmul.mubr.msk.bf16.vlgmr.msra.gmra.mrb[40].mxu0 %vm474_vm0, %v3167_v10  ;;  %2608 = vmatmul.mubr.msk.bf16.vlgmr.msra.gmra.mrb[40].mxu1 %vm474_vm0, %v3241_v38  ;;  %v2802_v10 = vld [vmem:[%s3607_s3 + $0x98] sm:$0xff]  }
 0x5bb   : > { %2597 = vmatprep.mubr.msk.bf16.mxu0 %vm474_vm0, %v3173_v11  ;;  %2620 = vmatpush3.bf16.msra.mxu0 %v2799_v50  ;;  %v2803_v11 = vld [vmem:[%s3607_s3 + $0xa0] sm:$0xff]   ;;  %v2806_v38 = vld [vmem:[%s3607_s3 + $0xb8] sm:$0xff]  }
 0x5bc   : > { %2621 = vmatprep.subr.bf16.mxu0 %v2800_v7  ;;  %2611 = vmatprep.mubr.msk.bf16.mxu1 %vm474_vm0, %v3253_v47 }
 0x5bf   : > { %2622 = vmatpush3.bf16.msra.mxu0 %v2800_v7 }
 0x5c0   : > { %2623 = vmatprep.subr.bf16.mxu0 %v2801_v13 }
 0x5c2   : > { %2598 = vmatmul.mubr.msk.bf16.gmra.mrb[44].mxu0 %vm474_vm0, %v3196_v19  ;;  %2612 = vmatmul.mubr.msk.bf16.gmra.mrb[44].mxu1 %vm474_vm0, %v3255_v48  ;;  %v2804_v19 = vld [vmem:[%s3607_s3 + $0xa8] sm:$0xff]  }
 0x5c3   : > { %2601 = vmatprep.mubr.msk.bf16.mxu0 %vm474_vm0, %v3203_v21  ;;  %2624 = vmatpush3.bf16.msra.mxu0 %v2801_v13  ;;  %v2805_v21 = vld [vmem:[%s3607_s3 + $0xb0] sm:$0xff]  }
 0x5c4   : > { %2625 = vmatprep.subr.bf16.mxu0 %v2802_v10  ;;  %2615 = vmatprep.mubr.msk.bf16.mxu1 %vm474_vm0, %v3267_v57 }
 0x5c7   : > { %2626 = vmatpush3.bf16.msra.mxu0 %v2802_v10 }
 0x5c8   : > { %2627 = vmatprep.subr.bf16.mxu0 %v2803_v11 }
 0x5ca   : > { %2602 = vmatmul.mubr.msk.bf16.gmra.mrb[48].mxu0 %vm474_vm0, %v3214_v25  ;;  %2616 = vmatmul.mubr.msk.bf16.gmra.mrb[48].mxu1 %vm474_vm0, %v3269_v58 }
 0x5cb   : > { %2628 = vmatpush3.bf16.msra.mxu0 %v2803_v11  ;;  %2659 = vmatprep.mubr.msk.bf16.mxu1 %vm2956_vm1, %v2955_v35 }
 0x5cc   : > { %2629 = vmatprep.subr.bf16.mxu0 %v2804_v19 }
 0x5cf   : > { %2630 = vmatpush3.bf16.msra.mxu0 %v2804_v19 }
 0x5d0   : > { %2631 = vmatprep.subr.bf16.mxu0 %v2805_v21 }
 0x5d3   : > { %2632 = vmatpush3.bf16.msra.mxu0 %v2805_v21 }
 0x5d4   : > { %2633 = vmatprep.subr.bf16.mxu0 %v2806_v38 }
 0x5d7   : > { %2634 = vmatpush3.bf16.msra.mxu0 %v2806_v38 }
 0x5d8   : > { %2683 = vmatprep.subr.bf16.mxu0 %v2955_v35 }
 0x68d   : > { %v2595_v25 = vpop.f32.mrb[40].mxu0  ;;  %v2609_v8 = vpop.f32.mrb[40].mxu1 }
 0x68e   : > { %v1445_v47 = vpop.f32.mrb[41].mxu0  ;;  %v1526_v44 = vpop.f32.mrb[41].mxu1  ;;  %v1747_v24 = vsel %vm442_vm2, 1.0, %v2609_v8 }
 0x68f   : > { %v2596_v48 = vpop.f32.mrb[42].mxu0  ;;  %v2610_v37 = vpop.f32.mrb[42].mxu1  ;;  %v1745_v27 = vsel %vm442_vm2, 1.0, %v1526_v44 }
 0x690   : > { %v1574_v57 = vpack.c.bf16 %v2596_v48, %v2595_v25  ;;  %v1448_v58 = vpop.f32.mrb[43].mxu0  ;;  %v1529_v63 = vpop.f32.mrb[43].mxu1  ;;  %v1748_v45 = vsel %vm442_vm2, 1.0, %v2610_v37 }
 0x691   : > { %v1573_v14 = vpack.c.bf16 %v1448_v58, %v1445_v47  ;;  %v1746_v32 = vsel %vm442_vm2, 1.0, %v1529_v63 }
 0x693   : > { %2635 = vmatprep.mubr.bf16.mxu0 %v1573_v14 }
 0x694   : > { %2636 = vmatmul.mubr.bf16.vlgmr.msra.gmra.mrb[52].mxu0 %v1574_v57 }
 0x695   : > { %v2599_v51 = vpop.f32.mrb[44].mxu0  ;;  %v2613_v40 = vpop.f32.mrb[44].mxu1 }
 0x696   : > { %v1461_v52 = vpop.f32.mrb[45].mxu0  ;;  %v1542_v41 = vpop.f32.mrb[45].mxu1  ;;  %v1751_v25 = vsel %vm442_vm2, 1.0, %v2613_v40 }
 0x697   : > { %v2600_v53 = vpop.f32.mrb[46].mxu0  ;;  %v2614_v12 = vpop.f32.mrb[46].mxu1  ;;  %v1749_v58 = vsel %vm442_vm2, 1.0, %v1542_v41 }
 0x698   : > { %v1576_v54 = vpack.c.bf16 %v2600_v53, %v2599_v51  ;;  %v1464_v55 = vpop.f32.mrb[47].mxu0  ;;  %v1545_v15 = vpop.f32.mrb[47].mxu1 }
 0x699   : > { %v1575_v56 = vpack.c.bf16 %v1464_v55, %v1461_v52 }
 0x69b   : > { %2639 = vmatprep.mubr.bf16.mxu0 %v1575_v56  ;;  %v1752_v56 = vsel %vm442_vm2, 1.0, %v2614_v12 }
 0x69c   : > { %2640 = vmatmul.mubr.bf16.gmra.mrb[56].mxu0 %v1576_v54 }
 0x69d   : > { %v2603_v33 = vpop.f32.mrb[48].mxu0  ;;  %v2617_v16 = vpop.f32.mrb[48].mxu1 }
 0x69e   : > { %v1477_v59 = vpop.f32.mrb[49].mxu0  ;;  %v1558_v17 = vpop.f32.mrb[49].mxu1  ;;  %v1755_v40 = vsel %vm442_vm2, 1.0, %v2617_v16 }
 0x69f   : > { %v2604_v34 = vpop.f32.mrb[50].mxu0  ;;  %v3488_v0 = vpop.f32.mrb[50].mxu1 }
 0x6a0   : > { %v1578_v60 = vpack.c.bf16 %v2604_v34, %v2603_v33  ;;  %v1480_v61 = vpop.f32.mrb[51].mxu0  ;;  %v3490_v2 = vpop.f32.mrb[51].mxu1 }
 0x6a1   : > { %v1577_v62 = vpack.c.bf16 %v1480_v61, %v1477_v59  ;;  %v1750_v59 = vsel %vm442_vm2, 1.0, %v1545_v15  ;;  %v1753_v15 = vsel %vm442_vm2, 1.0, %v1558_v17 }
 0x6a3   : > { %2643 = vmatprep.mubr.bf16.mxu0 %v1577_v62 }
 0x6a4   : > { %2644 = vmatmul.mubr.bf16.gmra.mrb[60].mxu0 %v1578_v60 }
 0x6a5   : > { %2699 = vmatprep.mubr.msk.bf16.mxu0 %vm2956_vm1, %v2955_v35 }
 0x767   : > { %v2637_v18 = vpop.f32.mrb[52].mxu0 }
 0x768   : > { %v1695_v3 = vadd.f32 %v2637_v18, %v2291_v1  ;;  %v1686_v20 = vpop.f32.mrb[53].mxu0 }
 0x769   : > { %v1687_v22 = vadd.f32 %v2291_v1, %v1686_v20  ;;  %v2638_v23 = vpop.f32.mrb[54].mxu0 }
 0x76a   : > { %v1735_v26 = vmax.f32 %v1695_v3, 0.0  ;;  %v1698_v36 = vadd.f32 %v2638_v23, %v2291_v1  ;;  %v1689_v28 = vpop.f32.mrb[55].mxu0 }
 0x76b   : > { %v1733_v4 = vmax.f32 %v1687_v22, 0.0  ;;  %v1690_v29 = vadd.f32 %v2291_v1, %v1689_v28  ;;  %v1754_v28 = vsel %vm442_vm2, 1.0, %v3490_v2  ;;  %v2810_v2 = vld [vmem:[#allocation2 + $0x18] sm:$0xff]  }
 0x76c   : > { %v1736_v30 = vmax.f32 %v1698_v36, 0.0  ;;  %v1759_v6 = vmul.f32 %v1747_v24, %v1735_v26  ;;  %v1756_v36 = vsel %vm442_vm2, 1.0, %v3488_v0  ;;  %v2808_v0 = vld [vmem:[#allocation2 + $0x8] sm:$0xff]  }
 0x76d   : > { %v1734_v5 = vmax.f32 %v1690_v29, 0.0  ;;  %v1757_v31 = vmul.f32 %v1745_v27, %v1733_v4  ;;  %v2807_v4 = vld [vmem:[#allocation2] sm:$0xff]  }
 0x76e   : > { %v1760_v49 = vmul.f32 %v1748_v45, %v1736_v30  ;;  %v2811_v29 = vld [vmem:[#allocation2 + $0x20] sm:$0xff]   ;;  %v2813_v30 = vld [vmem:[#allocation2 + $0x30] sm:$0xff]  }
 0x76f   : > { %v1758_v50 = vmul.f32 %v1746_v32, %v1734_v5  ;;  %v2641_v7 = vpop.f32.mrb[56].mxu0  ;;  %v2815_v5 = vld [vmem:[#allocation5] sm:$0xff]   ;;  %v2817_v45 = vld [vmem:[#allocation5 + $0x10] sm:$0xff]  }
 0x770   : > { %v1770_v13 = vpack.c.bf16 %v1760_v49, %v1759_v6  ;;  %v1711_v10 = vadd.f32 %v2641_v7, %v2291_v1  ;;  %v1702_v11 = vpop.f32.mrb[57].mxu0  ;;  %v2814_v6 = vld [vmem:[#allocation2 + $0x38] sm:$0xff]   ;;  %2684 = vmatpush3.bf16.msra.mxu0 %v2815_v5  ;;  %v2819_v32 = vld [vmem:[#allocation5 + $0x20] sm:$0xff]  }
 0x771   : > { %v1769_v19 = vpack.c.bf16 %v1758_v50, %v1757_v31  ;;  %v1703_v21 = vadd.f32 %v2291_v1, %v1702_v11  ;;  %v2642_v38 = vpop.f32.mrb[58].mxu0  ;;  %v2816_v31 = vld [vmem:[#allocation5 + $0x8] sm:$0xff]   ;;  %2685 = vmatprep.subr.bf16.mxu0 %v2955_v35  ;;  %v2818_v49 = vld [vmem:[#allocation5 + $0x18] sm:$0xff]  }
 0x772   : > { %v1739_v47 = vmax.f32 %v1711_v10, 0.0  ;;  %v1714_v48 = vadd.f32 %v2642_v38, %v2291_v1  ;;  %v1705_v57 = vpop.f32.mrb[59].mxu0  ;;  %v2820_v50 = vld [vmem:[#allocation5 + $0x28] sm:$0xff]  }
 0x773   : > { %v1737_v14 = vmax.f32 %v1703_v21, 0.0  ;;  %v1706_v51 = vadd.f32 %v2291_v1, %v1705_v57  ;;  %2648 = vmatpush3.bf16.msra.mxu1 %v1769_v19 }
 0x774   : > { %v1740_v52 = vmax.f32 %v1714_v48, 0.0  ;;  %v1763_v53 = vmul.f32 %v1751_v25, %v1739_v47  ;;  %2649 = vmatprep.subr.bf16.mxu1 %v2955_v35  ;;  %2686 = vmatpush3.bf16.msra.mxu0 %v2816_v31 }
 0x775   : > { %v1738_v54 = vmax.f32 %v1706_v51, 0.0  ;;  %v1761_v55 = vmul.f32 %v1749_v58, %v1737_v14  ;;  %2687 = vmatprep.subr.bf16.mxu0 %v2955_v35 }
 0x776   : > { %v1764_v33 = vmul.f32 %v1752_v56, %v1740_v52 }
 0x777   : > { %v1762_v34 = vmul.f32 %v1750_v59, %v1738_v54  ;;  %v2645_v60 = vpop.f32.mrb[60].mxu0  ;;  %2650 = vmatpush3.bf16.msra.mxu1 %v1770_v13  ;;  %v2822_v54 = vld [vmem:[#allocation5 + $0x38] sm:$0xff]  }
 0x778   : > { %v1772_v61 = vpack.c.bf16 %v1764_v33, %v1763_v53  ;;  %v1727_v62 = vadd.f32 %v2645_v60, %v2291_v1  ;;  %v1718_v8 = vpop.f32.mrb[61].mxu0  ;;  %2651 = vmatprep.subr.bf16.mxu1 %v2955_v35  ;;  %2688 = vmatpush3.bf16.msra.mxu0 %v2817_v45  ;;  %v2821_v53 = vld [vmem:[#allocation5 + $0x30] sm:$0xff]  }
 0x779   : > { %v1771_v44 = vpack.c.bf16 %v1762_v34, %v1761_v55  ;;  %v1719_v37 = vadd.f32 %v2291_v1, %v1718_v8  ;;  %v2646_v63 = vpop.f32.mrb[62].mxu0  ;;  %2689 = vmatprep.subr.bf16.mxu0 %v2955_v35 }
 0x77a   : > { %v1743_v41 = vmax.f32 %v1727_v62, 0.0  ;;  %v1730_v12 = vadd.f32 %v2646_v63, %v2291_v1  ;;  %v1721_v18 = vpop.f32.mrb[63].mxu0 }
 0x77b   : > { %v1741_v3 = vmax.f32 %v1719_v37, 0.0  ;;  %v1722_v20 = vadd.f32 %v2291_v1, %v1721_v18  ;;  %2652 = vmatpush3.bf16.msra.mxu1 %v1771_v44 }
 0x77c   : > { %v1744_v22 = vmax.f32 %v1730_v12, 0.0  ;;  %v1767_v23 = vmul.f32 %v1755_v40, %v1743_v41  ;;  %2653 = vmatprep.subr.bf16.mxu1 %v2955_v35  ;;  %2690 = vmatpush3.bf16.msra.mxu0 %v2818_v49 }
 0x77d   : > { %v1742_v24 = vmax.f32 %v1722_v20, 0.0  ;;  %v1765_v26 = vmul.f32 %v1753_v15, %v1741_v3  ;;  %2691 = vmatprep.subr.bf16.mxu0 %v2955_v35 }
 0x77e   : > { %v1768_v16 = vmul.f32 %v1756_v36, %v1744_v22 }
 0x77f   : > { %v1766_v27 = vmul.f32 %v1754_v28, %v1742_v24  ;;  %2654 = vmatpush3.bf16.msra.mxu1 %v1772_v61  ;;  %v2041_v61 = vshrl.u32 %v440_v42, 7 }
 0x780   : > { %v1774_v17 = vpack.c.bf16 %v1768_v16, %v1767_v23  ;;  %2655 = vmatprep.subr.bf16.mxu1 %v2955_v35  ;;  %2692 = vmatpush3.bf16.msra.mxu0 %v2819_v32 }
 0x781   : > { %v1773_v1 = vpack.c.bf16 %v1766_v27, %v1765_v26  ;;  %2693 = vmatprep.subr.bf16.mxu0 %v2955_v35  ;;  %v2042_v62 = vsub.s32 0, %v2041_v61 }
 0x783   : > { %2656 = vmatpush3.bf16.msra.mxu1 %v1773_v1 }
 0x784   : > { %2657 = vmatprep.subr.bf16.mxu1 %v2955_v35  ;;  %2694 = vmatpush3.bf16.msra.mxu0 %v2820_v50 }
 0x785   : > { %2695 = vmatprep.subr.bf16.mxu0 %v2955_v35 }
 0x787   : > { %2658 = vmatpush3.bf16.msra.mxu1 %v1774_v17 }
 0x788   : > { %2663 = vmatprep.subr.bf16.mxu1 %v2955_v35  ;;  %2696 = vmatpush3.bf16.msra.mxu0 %v2821_v53 }
 0x789   : > { %2697 = vmatprep.subr.bf16.mxu0 %v2955_v35 }
 0x78a   : > { %2660 = vmatmul.mubr.msk.bf16.vlgmr.msra.gmra.mrb[52].mxu1 %vm955_vm3, %v3325_v9  ;;  %v2812_v9 = vld [vmem:[#allocation2 + $0x28] sm:$0xff]  }
 0x78b   : > { %2664 = vmatpush3.bf16.msra.mxu1 %v2807_v4  ;;  %2679 = vmatprep.mubr.msk.bf16.mxu1 %vm2956_vm1, %v2955_v35 }
 0x78c   : > { %2665 = vmatprep.subr.bf16.mxu1 %v2955_v35  ;;  %2698 = vmatpush3.bf16.msra.mxu0 %v2822_v54 }
 0x78f   : > { %2666 = vmatpush3.bf16.msra.mxu1 %v2808_v0 }
 0x790   : > { %2667 = vmatprep.subr.bf16.mxu1 %v2955_v35 }
 0x793   : > { %2668 = vmatpush3.bf16.msra.mxu1 %v2809_v43 }
 0x794   : > { %2669 = vmatprep.subr.bf16.mxu1 %v2955_v35 }
 0x797   : > { %2670 = vmatpush3.bf16.msra.mxu1 %v2810_v2 }
 0x798   : > { %2671 = vmatprep.subr.bf16.mxu1 %v2955_v35 }
 0x79b   : > { %2672 = vmatpush3.bf16.msra.mxu1 %v2811_v29 }
 0x79c   : > { %2673 = vmatprep.subr.bf16.mxu1 %v2955_v35 }
 0x79f   : > { %2674 = vmatpush3.bf16.msra.mxu1 %v2812_v9 }
 0x7a0   : > { %2675 = vmatprep.subr.bf16.mxu1 %v2955_v35 }
 0x7a3   : > { %2676 = vmatpush3.bf16.msra.mxu1 %v2813_v30 }
 0x7a4   : > { %2677 = vmatprep.subr.bf16.mxu1 %v2955_v35  ;;  %v1951_v35 = vld [vmem:[%s3612_s8] sm:$0x1] }
 0x7a7   : > { %2678 = vmatpush3.bf16.msra.mxu1 %v2814_v6 }
 0x85d   : > { %v1809_v7 = vpop.f32.mrb[52].mxu1 }
 0x85e   : > { %v2661_v13 = vpop.f32.mrb[53].mxu1  ;;  %v1816_v11 = vadd.f32 %v1809_v7, %v3431_v39  ;;  %v1844_v39 = vld [vmem:[%s3610_s6] sm:$0x1] }
 0x85f   : > { %v1812_v10 = vpop.f32.mrb[54].mxu1 }
 0x860   : > { %v1817_v19 = vadd.f32 %v1812_v10, %v3434_v46  ;;  %v2662_v21 = vpop.f32.mrb[55].mxu1 }
 0x862   : > { %v1818_v38 = vadd.f32 %v1817_v19, %v1816_v11 }
 0x864   : > { %v1819_v25 = vrot.slane %v1818_v38, 4 }
 0x866   : > { %v1820_v47 = vadd.f32 %v1819_v25, %v1818_v38 }
 0x868   : > { %v1821_v48 = vrot.slane %v1820_v47, 2 }
 0x86a   : > { %v1822_v57 = vadd.f32 %v1821_v48, %v1820_v47 }
 0x86c   : > { %v1823_v58 = vrot.slane %v1822_v57, 1 }
 0x86e   : > { %v1824_v14 = vadd.f32 %v1823_v58, %v1822_v57 }
 0x870   : > { %v1826_v51 = vmul.f32 0.0625, %v1824_v14 }
 0x872   : > { %v1827_v52 = vpack.c.bf16 %v1826_v51, %v1826_v51 }
 0x874   : > { %2680 = vmatmul.mubr.bf16.vlgmr.msra.gmra.mrb[56].mxu1 %v1827_v52 }
 0x947   : > { %v1927_v46 = vpop.f32.mrb[56].mxu1 }
 0x948   : > { %v1928_v55 = vadd.f32 %v1927_v46, %v1844_v39  ;;  %v2681_v56 = vpop.f32.mrb[57].mxu1 }
 0x949   : > { %v1930_v33 = vpop.f32.mrb[58].mxu1 }
 0x94a   : > { %v1933_v59 = vmax.f32 %v1928_v55, 0.0  ;;  %v2682_v34 = vpop.f32.mrb[59].mxu1 }
 0x94c   : > { %v1934_v60 = vpack.c.bf16 %v1933_v59, %v1933_v59 }
 0x94e   : > { %2700 = vmatmul.mubr.bf16.vlgmr.msra.gmra.mrb[64].mxu0 %v1934_v60 }
 0xa21   : > { %v2034_v8 = vpop.f32.mrb[64].mxu0 }
 0xa22   : > { %v2035_v44 = vadd.f32 %v2034_v8, %v1951_v35  ;;  %v2701_v37 = vpop.f32.mrb[65].mxu0 }
 0xa23   : > { %v2037_v63 = vpop.f32.mrb[66].mxu0 }
 0xa24   : > { %v2043_v40 = vrot.slane %v2035_v44, %v2042_v62  ;;  %v2702_v41 = vpop.f32.mrb[67].mxu0 }
 0xa26   : > { %v2044_v42 = vadd.f32 %v2043_v40, %v1816_v11  ;;  %v2045_v12 = vadd.f32 %v2043_v40, %v1817_v19 }
 0xa28   : > { %2046 = vst [vmem:[%s385_s15] sm:$0xff] %v2044_v42  ;;  %2047 = vst [vmem:[%s385_s15 + $0x8] sm:$0xff] %v2045_v12 }
 0xa29   : > { %2892 = shalt.err (!%p2889_p11)
}
 0xa2a   : > { %s2893_s17 = scalar_lea.hbm %s3561_s27, 256  ;;  %s2897_s23 = scalar_lea.hbm %s3613_s9, 512 }
 0xa2b   : > { %p2894_p13 = scmp.ne.s32.totalorder %s3561_s27, %s2893_s17  ;;  %p2898_p6 = scmp.lt.u32.totalorder %s3561_s27, %s3613_s9 }
 0xa2c   : > { %p2899_p9 = scmp.lt.u32.totalorder %s2897_s23, %s2893_s17  ;;  %p2901_p12 = scmp.lt.u32.totalorder %s2893_s17, %s3561_s27 }
 0xa2d   : > { %p2895_p5 = pnand %p2894_p13, %p3632_p1 }
 0xa2e   : > { %p2900_p10 = por %p2899_p9, %p2898_p6 }
 0xa2f   : > { %p2896_p0 = pneg %p2895_p5 }
 0xa30   : > { %p2902_p2 = por %p2901_p12, %p2900_p10 }
 0xa32   : > { %p2903_p3 = pnand %p2902_p2, %p2896_p0 }
 0xa34   : > { %2906 = shalt.err (!%p2903_p3)
}
 0xa35   : > { %s2958_s24 = smov 128   ;;  %s2959_s21 = smov 8  }
 0xa36   : > { %2712 = dma.vmem_to_hbm [thread:$0]  (%p3632_p1), %s3556_s18, 256, %s3561_s27, %s3563_s28, %s2958_s24, %s2958_s24, %s2959_s21  }
 0xa37 PF: > { %p2729_p4 = scmp.ge.s32.totalorder %s2949_s12, 2  ;;  %s2077_s26 = sand.u32 1, %s2937_s30  }
 0xa38   : > { %p3633_p7 = scmp.ne.s32.totalorder %s3624_s20, 0  ;;  %s2078_s13 = scalar_lea.sflag [#allocation4], %s2077_s26 }
 0xa3a   : > { %p2722_p8 = pnand %p2729_p4, %p3633_p7 }
 0xa3c   : > { %2932 = dma.done.wait (!%p2722_p8), %s2078_s13, 256  }
 0xa3d   : > { %2934 = vsyncadd (!%p2722_p8), %s2078_s13, 4294967040  ;;  %s3634_s12 = sld [smem:[#allocation12_spill]]  ;;  %s3635_s29 = sld [smem:[#allocation11_spill]] }
 0xa3e   : > { %s3636_s11 = sld [smem:[#allocation13_spill]]  ;;  %s3637_s30 = smov %s2941_s10 }
 0xa43   : > { %p21_p11 = scmp.ge.s32.totalorder %s3634_s12, 4   ;;  %s3638_s10 = smov %s3635_s29 }
 0xa45   :  { %23 = sbr.rel (!%p21_p11) target bundleno = 5 (0x5), region = 110 }
 0xa4c   :  { %2083 = vsyncpa [#allocation3], 1 }
 0xa4d   :  { %2085 = vsyncpa [#allocation3 + $0x1], 1 }
 0xa4e   :  { %2086 = vsyncpa [#allocation6], 1 }
 0xa4f   :  { %2087 = vsyncpa [#allocation4], 1 }
 0xa50   :  { %2089 = vsyncpa [#allocation4 + $0x1], 1 }

</bundles_post_ra>
